<compile_context>
chip_gen: v5e
topology: v5e:2x2
jax: 0.10.0
libtpu: 0.0.40
codegen_flags: <defaults>
</compile_context>

<pallas_src>
import functools

import jax
import jax.numpy as jnp
from jax import lax
from jax.experimental import pallas as pl
from jax.experimental.pallas import tpu as pltpu

LOOK_AHEAD = 1


# ----------------------------------------------------------------------------
# Pallas kernel: full forward pass (GRU recurrence + attention + FC head)
# ----------------------------------------------------------------------------
def _gru_attn_kernel(
    x2d_ref,      # (T*Bp, D)  time-major, batch padded to Bp, row = t*Bp + b
    wir_ref,      # (D, H)     W_ih gate r, transposed
    wiz_ref,      # (D, H)     W_ih gate z, transposed
    win_ref,      # (D, H)     W_ih gate n, transposed
    whr_ref,      # (H, H)     W_hh gate r, transposed
    whz_ref,      # (H, H)     W_hh gate z, transposed
    whn_ref,      # (H, H)     W_hh gate n, transposed
    bxr_ref,      # (1, H)     b_ih_r + b_hh_r
    bxz_ref,      # (1, H)     b_ih_z + b_hh_z
    bxn_ref,      # (1, H)     b_ih_n
    bhn_ref,      # (1, H)     b_hh_n   (applied inside r * (...), per PyTorch)
    wa1T_ref,     # (H, H)     attention weight acting on hn
    wa2T_ref,     # (H, H)     attention weight acting on encoder outputs
    battn_ref,    # (1, H)
    v_ref,        # (1, H)     attention scoring vector
    wfcT_ref,     # (H, O)     fc weights, transposed (O = outputDim * lookAhead)
    bfc_ref,      # (1, O)
    out_ref,      # (Bp, O)
    *, T, Bp,
):
    H = whr_ref.shape[0]

    x2d = x2d_ref[...]

    # ---- input projections: ONE pass over all timesteps, off the serial path
    gx_r = jnp.dot(x2d, wir_ref[...], preferred_element_type=jnp.float32) + bxr_ref[...]
    gx_z = jnp.dot(x2d, wiz_ref[...], preferred_element_type=jnp.float32) + bxz_ref[...]
    gx_n = jnp.dot(x2d, win_ref[...], preferred_element_type=jnp.float32) + bxn_ref[...]

    whr = whr_ref[...]
    whz = whz_ref[...]
    whn = whn_ref[...]
    bhn = bhn_ref[...]

    # ---- GRU recurrence (PyTorch gate order r, z, n), fully unrolled ----
    h = jnp.zeros((Bp, H), dtype=jnp.float32)
    h_list = []
    for t in range(T):                      # static unroll (T is tiny)
        lo = t * Bp                         # sublane-aligned static offset
        gh_r = jnp.dot(h, whr, preferred_element_type=jnp.float32)
        gh_z = jnp.dot(h, whz, preferred_element_type=jnp.float32)
        gh_n = jnp.dot(h, whn, preferred_element_type=jnp.float32)
        r = jax.nn.sigmoid(gx_r[lo:lo + Bp, :] + gh_r)
        z = jax.nn.sigmoid(gx_z[lo:lo + Bp, :] + gh_z)
        n = jnp.tanh(gx_n[lo:lo + Bp, :] + r * (gh_n + bhn))
        h = (1.0 - z) * n + z * h
        h_list.append(h)

    hn = h                                              # (Bp, H) final hidden
    rnn2d = jnp.concatenate(h_list, axis=0)             # (T*Bp, H), row = t*Bp+b

    # ---- Attention ----------------------------------------------------------
    hn_proj = (jnp.dot(hn, wa1T_ref[...], preferred_element_type=jnp.float32)
               + battn_ref[...])                                       # (Bp, H)
    enc_proj = jnp.dot(rnn2d, wa2T_ref[...],
                       preferred_element_type=jnp.float32)             # (T*Bp, H)
    energy = jnp.tanh(enc_proj + jnp.tile(hn_proj, (T, 1)))            # (T*Bp, H)
    scores = jnp.sum(energy * v_ref[...], axis=-1, keepdims=True)      # (T*Bp, 1)

    # softmax over the time axis per batch row (matches F.softmax on (B,T), dim=1)
    s_list = [scores[t * Bp:(t + 1) * Bp, :] for t in range(T)]        # each (Bp, 1)
    m = s_list[0]
    for t in range(1, T):
        m = jnp.maximum(m, s_list[t])
    e_list = [jnp.exp(s - m) for s in s_list]
    denom = e_list[0]
    for t in range(1, T):
        denom = denom + e_list[t]

    # context[b, h] = sum_t softmax_t[b] * h_t[b, h]
    ctx = e_list[0] * h_list[0]
    for t in range(1, T):
        ctx = ctx + e_list[t] * h_list[t]
    context = ctx * (1.0 / denom)                                      # (Bp, H)

    # ---- FC head + constrained output transforms ---------------------------
    fc = (jnp.dot(context, wfcT_ref[...], preferred_element_type=jnp.float32)
          + bfc_ref[...])                                              # (Bp, O)
    sig = jax.nn.sigmoid(fc)
    cols = lax.broadcasted_iota(jnp.int32, fc.shape, 1)
    out = jnp.where(
        cols < LOOK_AHEAD, 2.0 * sig - 1.0,
        jnp.where(cols < 2 * LOOK_AHEAD, 10.0 * sig, fc))
    out_ref[...] = out


# ----------------------------------------------------------------------------
# Wrapper
# ----------------------------------------------------------------------------
def gru_model_m_month_forward(x, params):
    """x: (B, T, D) float32.  Returns (B, outputDim * lookAhead)."""
    B, T, D = x.shape
    H = params["w_hh"].shape[1]
    O = params["w_fc"].shape[0]

    Bp = ((B + 7) // 8) * 8                     # pad batch to 8 sublanes
    x_tbd = jnp.transpose(x, (1, 0, 2)).astype(jnp.float32)      # (T, B, D)
    x_pad = jnp.pad(x_tbd, ((0, 0), (0, Bp - B), (0, 0)))        # (T, Bp, D)
    x2d = x_pad.reshape(T * Bp, D)                               # row = t*Bp + b

    w_ih = params["w_ih"]                       # (3H, D)
    w_hh = params["w_hh"]                       # (3H, H)
    b_ih = params["b_ih"]
    b_hh = params["b_hh"]

    wir = w_ih[0:H].T
    wiz = w_ih[H:2 * H].T
    win = w_ih[2 * H:3 * H].T
    whr = w_hh[0:H].T
    whz = w_hh[H:2 * H].T
    whn = w_hh[2 * H:3 * H].T

    bxr = (b_ih[0:H] + b_hh[0:H]).reshape(1, H)
    bxz = (b_ih[H:2 * H] + b_hh[H:2 * H]).reshape(1, H)
    bxn = b_ih[2 * H:3 * H].reshape(1, H)
    bhn = b_hh[2 * H:3 * H].reshape(1, H)

    # attention linear: weight (H, 2H) -> part acting on hn | part on encoder out
    wa1T = params["w_attn"][:, :H].T
    wa2T = params["w_attn"][:, H:].T
    battn = params["b_attn"].reshape(1, H)
    v = params["v"].reshape(1, H)
    wfcT = params["w_fc"].T
    bfc = params["b_fc"].reshape(1, O)

    vmem = pl.BlockSpec(memory_space=pltpu.MemorySpace.VMEM)
    out_p = pl.pallas_call(
        functools.partial(_gru_attn_kernel, T=T, Bp=Bp),
        out_shape=jax.ShapeDtypeStruct((Bp, O), jnp.float32),
        in_specs=[vmem] * 17,
        out_specs=vmem,
    )(x2d, wir, wiz, win, whr, whz, whn,
      bxr, bxz, bxn, bhn, wa1T, wa2T, battn, v, wfcT, bfc)
    return out_p[:B]


# ----------------------------------------------------------------------------
# Pure-JAX reference (for correctness check)
# ----------------------------------------------------------------------------
def ref_forward(x, params):
    B, T, D = x.shape
    H = params["w_hh"].shape[1]

    def step(h, x_t):
        gx = x_t @ params["w_ih"].T + params["b_ih"]
        gh = h @ params["w_hh"].T + params["b_hh"]
        r = jax.nn.sigmoid(gx[:, :H] + gh[:, :H])
        z = jax.nn.sigmoid(gx[:, H:2 * H] + gh[:, H:2 * H])
        n = jnp.tanh(gx[:, 2 * H:] + r * gh[:, 2 * H:])
        h_new = (1.0 - z) * n + z * h
        return h_new, h_new

    hn, outs = lax.scan(step, jnp.zeros((B, H), jnp.float32),
                        jnp.transpose(x, (1, 0, 2)))
    rnn_out = jnp.transpose(outs, (1, 0, 2))                  # (B, T, H)

    hns = jnp.broadcast_to(hn[:, None, :], (B, T, H))
    energy = jnp.tanh(
        jnp.concatenate([hns, rnn_out], axis=2) @ params["w_attn"].T
        + params["b_attn"])
    scores = jnp.einsum("h,bth->bt", params["v"], energy)
    w = jax.nn.softmax(scores, axis=1)
    context = jnp.einsum("bt,bth->bh", w, rnn_out)
    fc = context @ params["w_fc"].T + params["b_fc"]
    sig = jax.nn.sigmoid(fc)
    fc = fc.at[:, 0:LOOK_AHEAD].set(2.0 * sig[:, 0:LOOK_AHEAD] - 1.0)
    fc = fc.at[:, LOOK_AHEAD:2 * LOOK_AHEAD].set(10.0 * sig[:, LOOK_AHEAD:2 * LOOK_AHEAD])
    return fc


# ----------------------------------------------------------------------------
# Deterministic parameter init (shapes per the PyTorch __init__)
# ----------------------------------------------------------------------------
def init_params(key, input_dim, hidden, output_dim, look_ahead):
    ks = jax.random.split(key, 10)
    k_gru = 1.0 / jnp.sqrt(hidden)
    u = lambda k, shape, s: jax.random.uniform(k, shape, jnp.float32, -s, s)
    return {
        "w_ih": u(ks[0], (3 * hidden, input_dim), k_gru),
        "w_hh": u(ks[1], (3 * hidden, hidden), k_gru),
        "b_ih": u(ks[2], (3 * hidden,), k_gru),
        "b_hh": u(ks[3], (3 * hidden,), k_gru),
        "w_attn": u(ks[4], (hidden, 2 * hidden), 1.0 / jnp.sqrt(2.0 * hidden)),
        "b_attn": u(ks[5], (hidden,), 1.0 / jnp.sqrt(2.0 * hidden)),
        "v": (1.0 / jnp.sqrt(hidden)) * jax.random.normal(ks[6], (hidden,), jnp.float32),
        "w_fc": u(ks[7], (output_dim * look_ahead, hidden), 1.0 / jnp.sqrt(hidden)),
        "b_fc": u(ks[8], (output_dim * look_ahead,), 1.0 / jnp.sqrt(hidden)),
    }


if __name__ == "__main__":
    # Small shapes: batch=2, lag (seq)=8, inputDim=4, hiddenNum=32,
    # outputDim=2, lookAhead=1, layerNum=1.
    B, T, D, H, OUT_DIM = 2, 8, 4, 32, 2

    key = jax.random.PRNGKey(0)
    kx, kp = jax.random.split(key)
    x = jax.random.normal(kx, (B, T, D), jnp.float32)
    params = init_params(kp, D, H, OUT_DIM, LOOK_AHEAD)

    out = jax.block_until_ready(gru_model_m_month_forward(x, params))
    ref = jax.block_until_ready(ref_forward(x, params))

    assert out.shape == (B, OUT_DIM * LOOK_AHEAD), out.shape
    assert jnp.allclose(out, ref, rtol=1e-3, atol=1e-3), (out, ref)
    print("KERNEL_OK")
</pallas_src>

<mosaic_0001>
module attributes {stable_mosaic.version = 11 : i64} {
  func.func @_gru_attn_kernel(%arg0: memref<64x4xf32, #tpu.memory_space<vmem>>, %arg1: memref<4x32xf32, #tpu.memory_space<vmem>>, %arg2: memref<4x32xf32, #tpu.memory_space<vmem>>, %arg3: memref<4x32xf32, #tpu.memory_space<vmem>>, %arg4: memref<32x32xf32, #tpu.memory_space<vmem>>, %arg5: memref<32x32xf32, #tpu.memory_space<vmem>>, %arg6: memref<32x32xf32, #tpu.memory_space<vmem>>, %arg7: memref<1x32xf32, #tpu.memory_space<vmem>>, %arg8: memref<1x32xf32, #tpu.memory_space<vmem>>, %arg9: memref<1x32xf32, #tpu.memory_space<vmem>>, %arg10: memref<1x32xf32, #tpu.memory_space<vmem>>, %arg11: memref<32x32xf32, #tpu.memory_space<vmem>>, %arg12: memref<32x32xf32, #tpu.memory_space<vmem>>, %arg13: memref<1x32xf32, #tpu.memory_space<vmem>>, %arg14: memref<1x32xf32, #tpu.memory_space<vmem>>, %arg15: memref<32x2xf32, #tpu.memory_space<vmem>>, %arg16: memref<1x2xf32, #tpu.memory_space<vmem>>, %arg17: memref<8x2xf32, #tpu.memory_space<vmem>>) attributes {dimension_semantics = [], scalar_prefetch = 0 : i64, scratch_operands = 0 : i64, tpu.core_type = #tpu.core_type<tc>} {
    %c0 = arith.constant 0 : index
    %c0_0 = arith.constant 0 : index
    %0 = vector.load %arg0[%c0, %c0_0] : memref<64x4xf32, #tpu.memory_space<vmem>>, vector<64x4xf32>
    %c0_1 = arith.constant 0 : index
    %c0_2 = arith.constant 0 : index
    %1 = vector.load %arg1[%c0_1, %c0_2] : memref<4x32xf32, #tpu.memory_space<vmem>>, vector<4x32xf32>
    %cst = arith.constant dense<0.000000e+00> : vector<64x32xf32>
    %2 = tpu.matmul %0, %1, %cst {dimension_numbers = #tpu.dot_dimension_numbers<[1], [0], [0], [1], [0, 0, 1, 1], [], []>} : vector<64x4xf32>, vector<4x32xf32>, vector<64x32xf32> -> vector<64x32xf32>
    %c0_3 = arith.constant 0 : index
    %c0_4 = arith.constant 0 : index
    %3 = vector.load %arg7[%c0_3, %c0_4] : memref<1x32xf32, #tpu.memory_space<vmem>>, vector<1x32xf32>
    %4 = vector.broadcast %3 : vector<1x32xf32> to vector<64x32xf32>
    %5 = arith.addf %2, %4 : vector<64x32xf32>
    %c0_5 = arith.constant 0 : index
    %c0_6 = arith.constant 0 : index
    %6 = vector.load %arg2[%c0_5, %c0_6] : memref<4x32xf32, #tpu.memory_space<vmem>>, vector<4x32xf32>
    %cst_7 = arith.constant dense<0.000000e+00> : vector<64x32xf32>
    %7 = tpu.matmul %0, %6, %cst_7 {dimension_numbers = #tpu.dot_dimension_numbers<[1], [0], [0], [1], [0, 0, 1, 1], [], []>} : vector<64x4xf32>, vector<4x32xf32>, vector<64x32xf32> -> vector<64x32xf32>
    %c0_8 = arith.constant 0 : index
    %c0_9 = arith.constant 0 : index
    %8 = vector.load %arg8[%c0_8, %c0_9] : memref<1x32xf32, #tpu.memory_space<vmem>>, vector<1x32xf32>
    %9 = vector.broadcast %8 : vector<1x32xf32> to vector<64x32xf32>
    %10 = arith.addf %7, %9 : vector<64x32xf32>
    %c0_10 = arith.constant 0 : index
    %c0_11 = arith.constant 0 : index
    %11 = vector.load %arg3[%c0_10, %c0_11] : memref<4x32xf32, #tpu.memory_space<vmem>>, vector<4x32xf32>
    %cst_12 = arith.constant dense<0.000000e+00> : vector<64x32xf32>
    %12 = tpu.matmul %0, %11, %cst_12 {dimension_numbers = #tpu.dot_dimension_numbers<[1], [0], [0], [1], [0, 0, 1, 1], [], []>} : vector<64x4xf32>, vector<4x32xf32>, vector<64x32xf32> -> vector<64x32xf32>
    %c0_13 = arith.constant 0 : index
    %c0_14 = arith.constant 0 : index
    %13 = vector.load %arg9[%c0_13, %c0_14] : memref<1x32xf32, #tpu.memory_space<vmem>>, vector<1x32xf32>
    %14 = vector.broadcast %13 : vector<1x32xf32> to vector<64x32xf32>
    %15 = arith.addf %12, %14 : vector<64x32xf32>
    %c0_15 = arith.constant 0 : index
    %c0_16 = arith.constant 0 : index
    %16 = vector.load %arg4[%c0_15, %c0_16] : memref<32x32xf32, #tpu.memory_space<vmem>>, vector<32x32xf32>
    %c0_17 = arith.constant 0 : index
    %c0_18 = arith.constant 0 : index
    %17 = vector.load %arg5[%c0_17, %c0_18] : memref<32x32xf32, #tpu.memory_space<vmem>>, vector<32x32xf32>
    %c0_19 = arith.constant 0 : index
    %c0_20 = arith.constant 0 : index
    %18 = vector.load %arg6[%c0_19, %c0_20] : memref<32x32xf32, #tpu.memory_space<vmem>>, vector<32x32xf32>
    %c0_21 = arith.constant 0 : index
    %c0_22 = arith.constant 0 : index
    %19 = vector.load %arg10[%c0_21, %c0_22] : memref<1x32xf32, #tpu.memory_space<vmem>>, vector<1x32xf32>
    %cst_23 = arith.constant 0.000000e+00 : f32
    %20 = vector.broadcast %cst_23 : f32 to vector<8x32xf32>
    %cst_24 = arith.constant dense<0.000000e+00> : vector<8x32xf32>
    %21 = tpu.matmul %20, %16, %cst_24 {dimension_numbers = #tpu.dot_dimension_numbers<[1], [0], [0], [1], [0, 0, 1, 1], [], []>} : vector<8x32xf32>, vector<32x32xf32>, vector<8x32xf32> -> vector<8x32xf32>
    %cst_25 = arith.constant dense<0.000000e+00> : vector<8x32xf32>
    %22 = tpu.matmul %20, %17, %cst_25 {dimension_numbers = #tpu.dot_dimension_numbers<[1], [0], [0], [1], [0, 0, 1, 1], [], []>} : vector<8x32xf32>, vector<32x32xf32>, vector<8x32xf32> -> vector<8x32xf32>
    %cst_26 = arith.constant dense<0.000000e+00> : vector<8x32xf32>
    %23 = tpu.matmul %20, %18, %cst_26 {dimension_numbers = #tpu.dot_dimension_numbers<[1], [0], [0], [1], [0, 0, 1, 1], [], []>} : vector<8x32xf32>, vector<32x32xf32>, vector<8x32xf32> -> vector<8x32xf32>
    %24 = vector.extract_strided_slice %5 {offsets = [0, 0], sizes = [8, 32], strides = [1, 1]} : vector<64x32xf32> to vector<8x32xf32>
    %25 = arith.addf %24, %21 : vector<8x32xf32>
    %26 = arith.negf %25 : vector<8x32xf32>
    %27 = math.exp %26 : vector<8x32xf32>
    %cst_27 = arith.constant 1.000000e+00 : f32
    %28 = vector.broadcast %cst_27 : f32 to vector<8x32xf32>
    %29 = arith.addf %28, %27 : vector<8x32xf32>
    %30 = arith.divf %28, %29 : vector<8x32xf32>
    %31 = vector.extract_strided_slice %10 {offsets = [0, 0], sizes = [8, 32], strides = [1, 1]} : vector<64x32xf32> to vector<8x32xf32>
    %32 = arith.addf %31, %22 : vector<8x32xf32>
    %33 = arith.negf %32 : vector<8x32xf32>
    %34 = math.exp %33 : vector<8x32xf32>
    %cst_28 = arith.constant 1.000000e+00 : f32
    %35 = vector.broadcast %cst_28 : f32 to vector<8x32xf32>
    %36 = arith.addf %35, %34 : vector<8x32xf32>
    %37 = arith.divf %35, %36 : vector<8x32xf32>
    %38 = vector.extract_strided_slice %15 {offsets = [0, 0], sizes = [8, 32], strides = [1, 1]} : vector<64x32xf32> to vector<8x32xf32>
    %39 = vector.broadcast %19 : vector<1x32xf32> to vector<8x32xf32>
    %40 = arith.addf %23, %39 : vector<8x32xf32>
    %41 = arith.mulf %30, %40 : vector<8x32xf32>
    %42 = arith.addf %38, %41 : vector<8x32xf32>
    %43 = math.tanh %42 : vector<8x32xf32>
    %cst_29 = arith.constant 1.000000e+00 : f32
    %44 = vector.broadcast %cst_29 : f32 to vector<8x32xf32>
    %45 = arith.subf %44, %37 : vector<8x32xf32>
    %46 = arith.mulf %45, %43 : vector<8x32xf32>
    %47 = arith.mulf %37, %20 : vector<8x32xf32>
    %48 = arith.addf %46, %47 : vector<8x32xf32>
    %cst_30 = arith.constant dense<0.000000e+00> : vector<8x32xf32>
    %49 = tpu.matmul %48, %16, %cst_30 {dimension_numbers = #tpu.dot_dimension_numbers<[1], [0], [0], [1], [0, 0, 1, 1], [], []>} : vector<8x32xf32>, vector<32x32xf32>, vector<8x32xf32> -> vector<8x32xf32>
    %cst_31 = arith.constant dense<0.000000e+00> : vector<8x32xf32>
    %50 = tpu.matmul %48, %17, %cst_31 {dimension_numbers = #tpu.dot_dimension_numbers<[1], [0], [0], [1], [0, 0, 1, 1], [], []>} : vector<8x32xf32>, vector<32x32xf32>, vector<8x32xf32> -> vector<8x32xf32>
    %cst_32 = arith.constant dense<0.000000e+00> : vector<8x32xf32>
    %51 = tpu.matmul %48, %18, %cst_32 {dimension_numbers = #tpu.dot_dimension_numbers<[1], [0], [0], [1], [0, 0, 1, 1], [], []>} : vector<8x32xf32>, vector<32x32xf32>, vector<8x32xf32> -> vector<8x32xf32>
    %52 = vector.extract_strided_slice %5 {offsets = [8, 0], sizes = [8, 32], strides = [1, 1]} : vector<64x32xf32> to vector<8x32xf32>
    %53 = arith.addf %52, %49 : vector<8x32xf32>
    %54 = arith.negf %53 : vector<8x32xf32>
    %55 = math.exp %54 : vector<8x32xf32>
    %cst_33 = arith.constant 1.000000e+00 : f32
    %56 = vector.broadcast %cst_33 : f32 to vector<8x32xf32>
    %57 = arith.addf %56, %55 : vector<8x32xf32>
    %58 = arith.divf %56, %57 : vector<8x32xf32>
    %59 = vector.extract_strided_slice %10 {offsets = [8, 0], sizes = [8, 32], strides = [1, 1]} : vector<64x32xf32> to vector<8x32xf32>
    %60 = arith.addf %59, %50 : vector<8x32xf32>
    %61 = arith.negf %60 : vector<8x32xf32>
    %62 = math.exp %61 : vector<8x32xf32>
    %cst_34 = arith.constant 1.000000e+00 : f32
    %63 = vector.broadcast %cst_34 : f32 to vector<8x32xf32>
    %64 = arith.addf %63, %62 : vector<8x32xf32>
    %65 = arith.divf %63, %64 : vector<8x32xf32>
    %66 = vector.extract_strided_slice %15 {offsets = [8, 0], sizes = [8, 32], strides = [1, 1]} : vector<64x32xf32> to vector<8x32xf32>
    %67 = vector.broadcast %19 : vector<1x32xf32> to vector<8x32xf32>
    %68 = arith.addf %51, %67 : vector<8x32xf32>
    %69 = arith.mulf %58, %68 : vector<8x32xf32>
    %70 = arith.addf %66, %69 : vector<8x32xf32>
    %71 = math.tanh %70 : vector<8x32xf32>
    %cst_35 = arith.constant 1.000000e+00 : f32
    %72 = vector.broadcast %cst_35 : f32 to vector<8x32xf32>
    %73 = arith.subf %72, %65 : vector<8x32xf32>
    %74 = arith.mulf %73, %71 : vector<8x32xf32>
    %75 = arith.mulf %65, %48 : vector<8x32xf32>
    %76 = arith.addf %74, %75 : vector<8x32xf32>
    %cst_36 = arith.constant dense<0.000000e+00> : vector<8x32xf32>
    %77 = tpu.matmul %76, %16, %cst_36 {dimension_numbers = #tpu.dot_dimension_numbers<[1], [0], [0], [1], [0, 0, 1, 1], [], []>} : vector<8x32xf32>, vector<32x32xf32>, vector<8x32xf32> -> vector<8x32xf32>
    %cst_37 = arith.constant dense<0.000000e+00> : vector<8x32xf32>
    %78 = tpu.matmul %76, %17, %cst_37 {dimension_numbers = #tpu.dot_dimension_numbers<[1], [0], [0], [1], [0, 0, 1, 1], [], []>} : vector<8x32xf32>, vector<32x32xf32>, vector<8x32xf32> -> vector<8x32xf32>
    %cst_38 = arith.constant dense<0.000000e+00> : vector<8x32xf32>
    %79 = tpu.matmul %76, %18, %cst_38 {dimension_numbers = #tpu.dot_dimension_numbers<[1], [0], [0], [1], [0, 0, 1, 1], [], []>} : vector<8x32xf32>, vector<32x32xf32>, vector<8x32xf32> -> vector<8x32xf32>
    %80 = vector.extract_strided_slice %5 {offsets = [16, 0], sizes = [8, 32], strides = [1, 1]} : vector<64x32xf32> to vector<8x32xf32>
    %81 = arith.addf %80, %77 : vector<8x32xf32>
    %82 = arith.negf %81 : vector<8x32xf32>
    %83 = math.exp %82 : vector<8x32xf32>
    %cst_39 = arith.constant 1.000000e+00 : f32
    %84 = vector.broadcast %cst_39 : f32 to vector<8x32xf32>
    %85 = arith.addf %84, %83 : vector<8x32xf32>
    %86 = arith.divf %84, %85 : vector<8x32xf32>
    %87 = vector.extract_strided_slice %10 {offsets = [16, 0], sizes = [8, 32], strides = [1, 1]} : vector<64x32xf32> to vector<8x32xf32>
    %88 = arith.addf %87, %78 : vector<8x32xf32>
    %89 = arith.negf %88 : vector<8x32xf32>
    %90 = math.exp %89 : vector<8x32xf32>
    %cst_40 = arith.constant 1.000000e+00 : f32
    %91 = vector.broadcast %cst_40 : f32 to vector<8x32xf32>
    %92 = arith.addf %91, %90 : vector<8x32xf32>
    %93 = arith.divf %91, %92 : vector<8x32xf32>
    %94 = vector.extract_strided_slice %15 {offsets = [16, 0], sizes = [8, 32], strides = [1, 1]} : vector<64x32xf32> to vector<8x32xf32>
    %95 = vector.broadcast %19 : vector<1x32xf32> to vector<8x32xf32>
    %96 = arith.addf %79, %95 : vector<8x32xf32>
    %97 = arith.mulf %86, %96 : vector<8x32xf32>
    %98 = arith.addf %94, %97 : vector<8x32xf32>
    %99 = math.tanh %98 : vector<8x32xf32>
    %cst_41 = arith.constant 1.000000e+00 : f32
    %100 = vector.broadcast %cst_41 : f32 to vector<8x32xf32>
    %101 = arith.subf %100, %93 : vector<8x32xf32>
    %102 = arith.mulf %101, %99 : vector<8x32xf32>
    %103 = arith.mulf %93, %76 : vector<8x32xf32>
    %104 = arith.addf %102, %103 : vector<8x32xf32>
    %cst_42 = arith.constant dense<0.000000e+00> : vector<8x32xf32>
    %105 = tpu.matmul %104, %16, %cst_42 {dimension_numbers = #tpu.dot_dimension_numbers<[1], [0], [0], [1], [0, 0, 1, 1], [], []>} : vector<8x32xf32>, vector<32x32xf32>, vector<8x32xf32> -> vector<8x32xf32>
    %cst_43 = arith.constant dense<0.000000e+00> : vector<8x32xf32>
    %106 = tpu.matmul %104, %17, %cst_43 {dimension_numbers = #tpu.dot_dimension_numbers<[1], [0], [0], [1], [0, 0, 1, 1], [], []>} : vector<8x32xf32>, vector<32x32xf32>, vector<8x32xf32> -> vector<8x32xf32>
    %cst_44 = arith.constant dense<0.000000e+00> : vector<8x32xf32>
    %107 = tpu.matmul %104, %18, %cst_44 {dimension_numbers = #tpu.dot_dimension_numbers<[1], [0], [0], [1], [0, 0, 1, 1], [], []>} : vector<8x32xf32>, vector<32x32xf32>, vector<8x32xf32> -> vector<8x32xf32>
    %108 = vector.extract_strided_slice %5 {offsets = [24, 0], sizes = [8, 32], strides = [1, 1]} : vector<64x32xf32> to vector<8x32xf32>
    %109 = arith.addf %108, %105 : vector<8x32xf32>
    %110 = arith.negf %109 : vector<8x32xf32>
    %111 = math.exp %110 : vector<8x32xf32>
    %cst_45 = arith.constant 1.000000e+00 : f32
    %112 = vector.broadcast %cst_45 : f32 to vector<8x32xf32>
    %113 = arith.addf %112, %111 : vector<8x32xf32>
    %114 = arith.divf %112, %113 : vector<8x32xf32>
    %115 = vector.extract_strided_slice %10 {offsets = [24, 0], sizes = [8, 32], strides = [1, 1]} : vector<64x32xf32> to vector<8x32xf32>
    %116 = arith.addf %115, %106 : vector<8x32xf32>
    %117 = arith.negf %116 : vector<8x32xf32>
    %118 = math.exp %117 : vector<8x32xf32>
    %cst_46 = arith.constant 1.000000e+00 : f32
    %119 = vector.broadcast %cst_46 : f32 to vector<8x32xf32>
    %120 = arith.addf %119, %118 : vector<8x32xf32>
    %121 = arith.divf %119, %120 : vector<8x32xf32>
    %122 = vector.extract_strided_slice %15 {offsets = [24, 0], sizes = [8, 32], strides = [1, 1]} : vector<64x32xf32> to vector<8x32xf32>
    %123 = vector.broadcast %19 : vector<1x32xf32> to vector<8x32xf32>
    %124 = arith.addf %107, %123 : vector<8x32xf32>
    %125 = arith.mulf %114, %124 : vector<8x32xf32>
    %126 = arith.addf %122, %125 : vector<8x32xf32>
    %127 = math.tanh %126 : vector<8x32xf32>
    %cst_47 = arith.constant 1.000000e+00 : f32
    %128 = vector.broadcast %cst_47 : f32 to vector<8x32xf32>
    %129 = arith.subf %128, %121 : vector<8x32xf32>
    %130 = arith.mulf %129, %127 : vector<8x32xf32>
    %131 = arith.mulf %121, %104 : vector<8x32xf32>
    %132 = arith.addf %130, %131 : vector<8x32xf32>
    %cst_48 = arith.constant dense<0.000000e+00> : vector<8x32xf32>
    %133 = tpu.matmul %132, %16, %cst_48 {dimension_numbers = #tpu.dot_dimension_numbers<[1], [0], [0], [1], [0, 0, 1, 1], [], []>} : vector<8x32xf32>, vector<32x32xf32>, vector<8x32xf32> -> vector<8x32xf32>
    %cst_49 = arith.constant dense<0.000000e+00> : vector<8x32xf32>
    %134 = tpu.matmul %132, %17, %cst_49 {dimension_numbers = #tpu.dot_dimension_numbers<[1], [0], [0], [1], [0, 0, 1, 1], [], []>} : vector<8x32xf32>, vector<32x32xf32>, vector<8x32xf32> -> vector<8x32xf32>
    %cst_50 = arith.constant dense<0.000000e+00> : vector<8x32xf32>
    %135 = tpu.matmul %132, %18, %cst_50 {dimension_numbers = #tpu.dot_dimension_numbers<[1], [0], [0], [1], [0, 0, 1, 1], [], []>} : vector<8x32xf32>, vector<32x32xf32>, vector<8x32xf32> -> vector<8x32xf32>
    %136 = vector.extract_strided_slice %5 {offsets = [32, 0], sizes = [8, 32], strides = [1, 1]} : vector<64x32xf32> to vector<8x32xf32>
    %137 = arith.addf %136, %133 : vector<8x32xf32>
    %138 = arith.negf %137 : vector<8x32xf32>
    %139 = math.exp %138 : vector<8x32xf32>
    %cst_51 = arith.constant 1.000000e+00 : f32
    %140 = vector.broadcast %cst_51 : f32 to vector<8x32xf32>
    %141 = arith.addf %140, %139 : vector<8x32xf32>
    %142 = arith.divf %140, %141 : vector<8x32xf32>
    %143 = vector.extract_strided_slice %10 {offsets = [32, 0], sizes = [8, 32], strides = [1, 1]} : vector<64x32xf32> to vector<8x32xf32>
    %144 = arith.addf %143, %134 : vector<8x32xf32>
    %145 = arith.negf %144 : vector<8x32xf32>
    %146 = math.exp %145 : vector<8x32xf32>
    %cst_52 = arith.constant 1.000000e+00 : f32
    %147 = vector.broadcast %cst_52 : f32 to vector<8x32xf32>
    %148 = arith.addf %147, %146 : vector<8x32xf32>
    %149 = arith.divf %147, %148 : vector<8x32xf32>
    %150 = vector.extract_strided_slice %15 {offsets = [32, 0], sizes = [8, 32], strides = [1, 1]} : vector<64x32xf32> to vector<8x32xf32>
    %151 = vector.broadcast %19 : vector<1x32xf32> to vector<8x32xf32>
    %152 = arith.addf %135, %151 : vector<8x32xf32>
    %153 = arith.mulf %142, %152 : vector<8x32xf32>
    %154 = arith.addf %150, %153 : vector<8x32xf32>
    %155 = math.tanh %154 : vector<8x32xf32>
    %cst_53 = arith.constant 1.000000e+00 : f32
    %156 = vector.broadcast %cst_53 : f32 to vector<8x32xf32>
    %157 = arith.subf %156, %149 : vector<8x32xf32>
    %158 = arith.mulf %157, %155 : vector<8x32xf32>
    %159 = arith.mulf %149, %132 : vector<8x32xf32>
    %160 = arith.addf %158, %159 : vector<8x32xf32>
    %cst_54 = arith.constant dense<0.000000e+00> : vector<8x32xf32>
    %161 = tpu.matmul %160, %16, %cst_54 {dimension_numbers = #tpu.dot_dimension_numbers<[1], [0], [0], [1], [0, 0, 1, 1], [], []>} : vector<8x32xf32>, vector<32x32xf32>, vector<8x32xf32> -> vector<8x32xf32>
    %cst_55 = arith.constant dense<0.000000e+00> : vector<8x32xf32>
    %162 = tpu.matmul %160, %17, %cst_55 {dimension_numbers = #tpu.dot_dimension_numbers<[1], [0], [0], [1], [0, 0, 1, 1], [], []>} : vector<8x32xf32>, vector<32x32xf32>, vector<8x32xf32> -> vector<8x32xf32>
    %cst_56 = arith.constant dense<0.000000e+00> : vector<8x32xf32>
    %163 = tpu.matmul %160, %18, %cst_56 {dimension_numbers = #tpu.dot_dimension_numbers<[1], [0], [0], [1], [0, 0, 1, 1], [], []>} : vector<8x32xf32>, vector<32x32xf32>, vector<8x32xf32> -> vector<8x32xf32>
    %164 = vector.extract_strided_slice %5 {offsets = [40, 0], sizes = [8, 32], strides = [1, 1]} : vector<64x32xf32> to vector<8x32xf32>
    %165 = arith.addf %164, %161 : vector<8x32xf32>
    %166 = arith.negf %165 : vector<8x32xf32>
    %167 = math.exp %166 : vector<8x32xf32>
    %cst_57 = arith.constant 1.000000e+00 : f32
    %168 = vector.broadcast %cst_57 : f32 to vector<8x32xf32>
    %169 = arith.addf %168, %167 : vector<8x32xf32>
    %170 = arith.divf %168, %169 : vector<8x32xf32>
    %171 = vector.extract_strided_slice %10 {offsets = [40, 0], sizes = [8, 32], strides = [1, 1]} : vector<64x32xf32> to vector<8x32xf32>
    %172 = arith.addf %171, %162 : vector<8x32xf32>
    %173 = arith.negf %172 : vector<8x32xf32>
    %174 = math.exp %173 : vector<8x32xf32>
    %cst_58 = arith.constant 1.000000e+00 : f32
    %175 = vector.broadcast %cst_58 : f32 to vector<8x32xf32>
    %176 = arith.addf %175, %174 : vector<8x32xf32>
    %177 = arith.divf %175, %176 : vector<8x32xf32>
    %178 = vector.extract_strided_slice %15 {offsets = [40, 0], sizes = [8, 32], strides = [1, 1]} : vector<64x32xf32> to vector<8x32xf32>
    %179 = vector.broadcast %19 : vector<1x32xf32> to vector<8x32xf32>
    %180 = arith.addf %163, %179 : vector<8x32xf32>
    %181 = arith.mulf %170, %180 : vector<8x32xf32>
    %182 = arith.addf %178, %181 : vector<8x32xf32>
    %183 = math.tanh %182 : vector<8x32xf32>
    %cst_59 = arith.constant 1.000000e+00 : f32
    %184 = vector.broadcast %cst_59 : f32 to vector<8x32xf32>
    %185 = arith.subf %184, %177 : vector<8x32xf32>
    %186 = arith.mulf %185, %183 : vector<8x32xf32>
    %187 = arith.mulf %177, %160 : vector<8x32xf32>
    %188 = arith.addf %186, %187 : vector<8x32xf32>
    %cst_60 = arith.constant dense<0.000000e+00> : vector<8x32xf32>
    %189 = tpu.matmul %188, %16, %cst_60 {dimension_numbers = #tpu.dot_dimension_numbers<[1], [0], [0], [1], [0, 0, 1, 1], [], []>} : vector<8x32xf32>, vector<32x32xf32>, vector<8x32xf32> -> vector<8x32xf32>
    %cst_61 = arith.constant dense<0.000000e+00> : vector<8x32xf32>
    %190 = tpu.matmul %188, %17, %cst_61 {dimension_numbers = #tpu.dot_dimension_numbers<[1], [0], [0], [1], [0, 0, 1, 1], [], []>} : vector<8x32xf32>, vector<32x32xf32>, vector<8x32xf32> -> vector<8x32xf32>
    %cst_62 = arith.constant dense<0.000000e+00> : vector<8x32xf32>
    %191 = tpu.matmul %188, %18, %cst_62 {dimension_numbers = #tpu.dot_dimension_numbers<[1], [0], [0], [1], [0, 0, 1, 1], [], []>} : vector<8x32xf32>, vector<32x32xf32>, vector<8x32xf32> -> vector<8x32xf32>
    %192 = vector.extract_strided_slice %5 {offsets = [48, 0], sizes = [8, 32], strides = [1, 1]} : vector<64x32xf32> to vector<8x32xf32>
    %193 = arith.addf %192, %189 : vector<8x32xf32>
    %194 = arith.negf %193 : vector<8x32xf32>
    %195 = math.exp %194 : vector<8x32xf32>
    %cst_63 = arith.constant 1.000000e+00 : f32
    %196 = vector.broadcast %cst_63 : f32 to vector<8x32xf32>
    %197 = arith.addf %196, %195 : vector<8x32xf32>
    %198 = arith.divf %196, %197 : vector<8x32xf32>
    %199 = vector.extract_strided_slice %10 {offsets = [48, 0], sizes = [8, 32], strides = [1, 1]} : vector<64x32xf32> to vector<8x32xf32>
    %200 = arith.addf %199, %190 : vector<8x32xf32>
    %201 = arith.negf %200 : vector<8x32xf32>
    %202 = math.exp %201 : vector<8x32xf32>
    %cst_64 = arith.constant 1.000000e+00 : f32
    %203 = vector.broadcast %cst_64 : f32 to vector<8x32xf32>
    %204 = arith.addf %203, %202 : vector<8x32xf32>
    %205 = arith.divf %203, %204 : vector<8x32xf32>
    %206 = vector.extract_strided_slice %15 {offsets = [48, 0], sizes = [8, 32], strides = [1, 1]} : vector<64x32xf32> to vector<8x32xf32>
    %207 = vector.broadcast %19 : vector<1x32xf32> to vector<8x32xf32>
    %208 = arith.addf %191, %207 : vector<8x32xf32>
    %209 = arith.mulf %198, %208 : vector<8x32xf32>
    %210 = arith.addf %206, %209 : vector<8x32xf32>
    %211 = math.tanh %210 : vector<8x32xf32>
    %cst_65 = arith.constant 1.000000e+00 : f32
    %212 = vector.broadcast %cst_65 : f32 to vector<8x32xf32>
    %213 = arith.subf %212, %205 : vector<8x32xf32>
    %214 = arith.mulf %213, %211 : vector<8x32xf32>
    %215 = arith.mulf %205, %188 : vector<8x32xf32>
    %216 = arith.addf %214, %215 : vector<8x32xf32>
    %cst_66 = arith.constant dense<0.000000e+00> : vector<8x32xf32>
    %217 = tpu.matmul %216, %16, %cst_66 {dimension_numbers = #tpu.dot_dimension_numbers<[1], [0], [0], [1], [0, 0, 1, 1], [], []>} : vector<8x32xf32>, vector<32x32xf32>, vector<8x32xf32> -> vector<8x32xf32>
    %cst_67 = arith.constant dense<0.000000e+00> : vector<8x32xf32>
    %218 = tpu.matmul %216, %17, %cst_67 {dimension_numbers = #tpu.dot_dimension_numbers<[1], [0], [0], [1], [0, 0, 1, 1], [], []>} : vector<8x32xf32>, vector<32x32xf32>, vector<8x32xf32> -> vector<8x32xf32>
    %cst_68 = arith.constant dense<0.000000e+00> : vector<8x32xf32>
    %219 = tpu.matmul %216, %18, %cst_68 {dimension_numbers = #tpu.dot_dimension_numbers<[1], [0], [0], [1], [0, 0, 1, 1], [], []>} : vector<8x32xf32>, vector<32x32xf32>, vector<8x32xf32> -> vector<8x32xf32>
    %220 = vector.extract_strided_slice %5 {offsets = [56, 0], sizes = [8, 32], strides = [1, 1]} : vector<64x32xf32> to vector<8x32xf32>
    %221 = arith.addf %220, %217 : vector<8x32xf32>
    %222 = arith.negf %221 : vector<8x32xf32>
    %223 = math.exp %222 : vector<8x32xf32>
    %cst_69 = arith.constant 1.000000e+00 : f32
    %224 = vector.broadcast %cst_69 : f32 to vector<8x32xf32>
    %225 = arith.addf %224, %223 : vector<8x32xf32>
    %226 = arith.divf %224, %225 : vector<8x32xf32>
    %227 = vector.extract_strided_slice %10 {offsets = [56, 0], sizes = [8, 32], strides = [1, 1]} : vector<64x32xf32> to vector<8x32xf32>
    %228 = arith.addf %227, %218 : vector<8x32xf32>
    %229 = arith.negf %228 : vector<8x32xf32>
    %230 = math.exp %229 : vector<8x32xf32>
    %cst_70 = arith.constant 1.000000e+00 : f32
    %231 = vector.broadcast %cst_70 : f32 to vector<8x32xf32>
    %232 = arith.addf %231, %230 : vector<8x32xf32>
    %233 = arith.divf %231, %232 : vector<8x32xf32>
    %234 = vector.extract_strided_slice %15 {offsets = [56, 0], sizes = [8, 32], strides = [1, 1]} : vector<64x32xf32> to vector<8x32xf32>
    %235 = vector.broadcast %19 : vector<1x32xf32> to vector<8x32xf32>
    %236 = arith.addf %219, %235 : vector<8x32xf32>
    %237 = arith.mulf %226, %236 : vector<8x32xf32>
    %238 = arith.addf %234, %237 : vector<8x32xf32>
    %239 = math.tanh %238 : vector<8x32xf32>
    %cst_71 = arith.constant 1.000000e+00 : f32
    %240 = vector.broadcast %cst_71 : f32 to vector<8x32xf32>
    %241 = arith.subf %240, %233 : vector<8x32xf32>
    %242 = arith.mulf %241, %239 : vector<8x32xf32>
    %243 = arith.mulf %233, %216 : vector<8x32xf32>
    %244 = arith.addf %242, %243 : vector<8x32xf32>
    %245 = tpu.concatenate %48, %76, %104, %132, %160, %188, %216, %244 in 0 : vector<8x32xf32>, vector<8x32xf32>, vector<8x32xf32>, vector<8x32xf32>, vector<8x32xf32>, vector<8x32xf32>, vector<8x32xf32>, vector<8x32xf32> -> vector<64x32xf32>
    %c0_72 = arith.constant 0 : index
    %c0_73 = arith.constant 0 : index
    %246 = vector.load %arg11[%c0_72, %c0_73] : memref<32x32xf32, #tpu.memory_space<vmem>>, vector<32x32xf32>
    %cst_74 = arith.constant dense<0.000000e+00> : vector<8x32xf32>
    %247 = tpu.matmul %244, %246, %cst_74 {dimension_numbers = #tpu.dot_dimension_numbers<[1], [0], [0], [1], [0, 0, 1, 1], [], []>} : vector<8x32xf32>, vector<32x32xf32>, vector<8x32xf32> -> vector<8x32xf32>
    %c0_75 = arith.constant 0 : index
    %c0_76 = arith.constant 0 : index
    %248 = vector.load %arg13[%c0_75, %c0_76] : memref<1x32xf32, #tpu.memory_space<vmem>>, vector<1x32xf32>
    %249 = vector.broadcast %248 : vector<1x32xf32> to vector<8x32xf32>
    %250 = arith.addf %247, %249 : vector<8x32xf32>
    %c0_77 = arith.constant 0 : index
    %c0_78 = arith.constant 0 : index
    %251 = vector.load %arg12[%c0_77, %c0_78] : memref<32x32xf32, #tpu.memory_space<vmem>>, vector<32x32xf32>
    %cst_79 = arith.constant dense<0.000000e+00> : vector<64x32xf32>
    %252 = tpu.matmul %245, %251, %cst_79 {dimension_numbers = #tpu.dot_dimension_numbers<[1], [0], [0], [1], [0, 0, 1, 1], [], []>} : vector<64x32xf32>, vector<32x32xf32>, vector<64x32xf32> -> vector<64x32xf32>
    %253 = tpu.concatenate %250, %250, %250, %250, %250, %250, %250, %250 in 0 : vector<8x32xf32>, vector<8x32xf32>, vector<8x32xf32>, vector<8x32xf32>, vector<8x32xf32>, vector<8x32xf32>, vector<8x32xf32>, vector<8x32xf32> -> vector<64x32xf32>
    %254 = arith.addf %252, %253 : vector<64x32xf32>
    %255 = math.tanh %254 : vector<64x32xf32>
    %c0_80 = arith.constant 0 : index
    %c0_81 = arith.constant 0 : index
    %256 = vector.load %arg14[%c0_80, %c0_81] : memref<1x32xf32, #tpu.memory_space<vmem>>, vector<1x32xf32>
    %257 = vector.broadcast %256 : vector<1x32xf32> to vector<64x32xf32>
    %258 = arith.mulf %255, %257 : vector<64x32xf32>
    %cst_82 = arith.constant dense<0.000000e+00> : vector<64xf32>
    %259 = vector.multi_reduction <add>, %258, %cst_82 [1] : vector<64x32xf32> to vector<64xf32>
    %260 = vector.shape_cast %259 : vector<64xf32> to vector<64x1xf32>
    %261 = vector.extract_strided_slice %260 {offsets = [0, 0], sizes = [8, 1], strides = [1, 1]} : vector<64x1xf32> to vector<8x1xf32>
    %262 = vector.extract_strided_slice %260 {offsets = [8, 0], sizes = [8, 1], strides = [1, 1]} : vector<64x1xf32> to vector<8x1xf32>
    %263 = vector.extract_strided_slice %260 {offsets = [16, 0], sizes = [8, 1], strides = [1, 1]} : vector<64x1xf32> to vector<8x1xf32>
    %264 = vector.extract_strided_slice %260 {offsets = [24, 0], sizes = [8, 1], strides = [1, 1]} : vector<64x1xf32> to vector<8x1xf32>
    %265 = vector.extract_strided_slice %260 {offsets = [32, 0], sizes = [8, 1], strides = [1, 1]} : vector<64x1xf32> to vector<8x1xf32>
    %266 = vector.extract_strided_slice %260 {offsets = [40, 0], sizes = [8, 1], strides = [1, 1]} : vector<64x1xf32> to vector<8x1xf32>
    %267 = vector.extract_strided_slice %260 {offsets = [48, 0], sizes = [8, 1], strides = [1, 1]} : vector<64x1xf32> to vector<8x1xf32>
    %268 = vector.extract_strided_slice %260 {offsets = [56, 0], sizes = [8, 1], strides = [1, 1]} : vector<64x1xf32> to vector<8x1xf32>
    %269 = arith.maximumf %261, %262 : vector<8x1xf32>
    %270 = arith.maximumf %269, %263 : vector<8x1xf32>
    %271 = arith.maximumf %270, %264 : vector<8x1xf32>
    %272 = arith.maximumf %271, %265 : vector<8x1xf32>
    %273 = arith.maximumf %272, %266 : vector<8x1xf32>
    %274 = arith.maximumf %273, %267 : vector<8x1xf32>
    %275 = arith.maximumf %274, %268 : vector<8x1xf32>
    %276 = arith.subf %261, %275 : vector<8x1xf32>
    %277 = math.exp %276 : vector<8x1xf32>
    %278 = arith.subf %262, %275 : vector<8x1xf32>
    %279 = math.exp %278 : vector<8x1xf32>
    %280 = arith.subf %263, %275 : vector<8x1xf32>
    %281 = math.exp %280 : vector<8x1xf32>
    %282 = arith.subf %264, %275 : vector<8x1xf32>
    %283 = math.exp %282 : vector<8x1xf32>
    %284 = arith.subf %265, %275 : vector<8x1xf32>
    %285 = math.exp %284 : vector<8x1xf32>
    %286 = arith.subf %266, %275 : vector<8x1xf32>
    %287 = math.exp %286 : vector<8x1xf32>
    %288 = arith.subf %267, %275 : vector<8x1xf32>
    %289 = math.exp %288 : vector<8x1xf32>
    %290 = arith.subf %268, %275 : vector<8x1xf32>
    %291 = math.exp %290 : vector<8x1xf32>
    %292 = arith.addf %277, %279 : vector<8x1xf32>
    %293 = arith.addf %292, %281 : vector<8x1xf32>
    %294 = arith.addf %293, %283 : vector<8x1xf32>
    %295 = arith.addf %294, %285 : vector<8x1xf32>
    %296 = arith.addf %295, %287 : vector<8x1xf32>
    %297 = arith.addf %296, %289 : vector<8x1xf32>
    %298 = arith.addf %297, %291 : vector<8x1xf32>
    %299 = vector.broadcast %277 : vector<8x1xf32> to vector<8x32xf32>
    %300 = arith.mulf %299, %48 : vector<8x32xf32>
    %301 = vector.broadcast %279 : vector<8x1xf32> to vector<8x32xf32>
    %302 = arith.mulf %301, %76 : vector<8x32xf32>
    %303 = arith.addf %300, %302 : vector<8x32xf32>
    %304 = vector.broadcast %281 : vector<8x1xf32> to vector<8x32xf32>
    %305 = arith.mulf %304, %104 : vector<8x32xf32>
    %306 = arith.addf %303, %305 : vector<8x32xf32>
    %307 = vector.broadcast %283 : vector<8x1xf32> to vector<8x32xf32>
    %308 = arith.mulf %307, %132 : vector<8x32xf32>
    %309 = arith.addf %306, %308 : vector<8x32xf32>
    %310 = vector.broadcast %285 : vector<8x1xf32> to vector<8x32xf32>
    %311 = arith.mulf %310, %160 : vector<8x32xf32>
    %312 = arith.addf %309, %311 : vector<8x32xf32>
    %313 = vector.broadcast %287 : vector<8x1xf32> to vector<8x32xf32>
    %314 = arith.mulf %313, %188 : vector<8x32xf32>
    %315 = arith.addf %312, %314 : vector<8x32xf32>
    %316 = vector.broadcast %289 : vector<8x1xf32> to vector<8x32xf32>
    %317 = arith.mulf %316, %216 : vector<8x32xf32>
    %318 = arith.addf %315, %317 : vector<8x32xf32>
    %319 = vector.broadcast %291 : vector<8x1xf32> to vector<8x32xf32>
    %320 = arith.mulf %319, %244 : vector<8x32xf32>
    %321 = arith.addf %318, %320 : vector<8x32xf32>
    %cst_83 = arith.constant 1.000000e+00 : f32
    %322 = vector.broadcast %cst_83 : f32 to vector<8x1xf32>
    %323 = arith.divf %322, %298 : vector<8x1xf32>
    %324 = vector.broadcast %323 : vector<8x1xf32> to vector<8x32xf32>
    %325 = arith.mulf %321, %324 : vector<8x32xf32>
    %c0_84 = arith.constant 0 : index
    %c0_85 = arith.constant 0 : index
    %326 = vector.load %arg15[%c0_84, %c0_85] : memref<32x2xf32, #tpu.memory_space<vmem>>, vector<32x2xf32>
    %cst_86 = arith.constant dense<0.000000e+00> : vector<8x2xf32>
    %327 = tpu.matmul %325, %326, %cst_86 {dimension_numbers = #tpu.dot_dimension_numbers<[1], [0], [0], [1], [0, 0, 1, 1], [], []>} : vector<8x32xf32>, vector<32x2xf32>, vector<8x2xf32> -> vector<8x2xf32>
    %c0_87 = arith.constant 0 : index
    %c0_88 = arith.constant 0 : index
    %328 = vector.load %arg16[%c0_87, %c0_88] : memref<1x2xf32, #tpu.memory_space<vmem>>, vector<1x2xf32>
    %329 = vector.broadcast %328 : vector<1x2xf32> to vector<8x2xf32>
    %330 = arith.addf %327, %329 : vector<8x2xf32>
    %331 = arith.negf %330 : vector<8x2xf32>
    %332 = math.exp %331 : vector<8x2xf32>
    %cst_89 = arith.constant 1.000000e+00 : f32
    %333 = vector.broadcast %cst_89 : f32 to vector<8x2xf32>
    %334 = arith.addf %333, %332 : vector<8x2xf32>
    %335 = arith.divf %333, %334 : vector<8x2xf32>
    %336 = tpu.iota {dimensions = array<i32: 1>} : vector<8x2xi32>
    %c1_i32 = arith.constant 1 : i32
    %337 = vector.broadcast %c1_i32 : i32 to vector<8x2xi32>
    %338 = arith.cmpi slt, %336, %337 : vector<8x2xi32>
    %cst_90 = arith.constant 2.000000e+00 : f32
    %339 = vector.broadcast %cst_90 : f32 to vector<8x2xf32>
    %340 = arith.mulf %339, %335 : vector<8x2xf32>
    %cst_91 = arith.constant 1.000000e+00 : f32
    %341 = vector.broadcast %cst_91 : f32 to vector<8x2xf32>
    %342 = arith.subf %340, %341 : vector<8x2xf32>
    %c2_i32 = arith.constant 2 : i32
    %343 = vector.broadcast %c2_i32 : i32 to vector<8x2xi32>
    %344 = arith.cmpi slt, %336, %343 : vector<8x2xi32>
    %cst_92 = arith.constant 1.000000e+01 : f32
    %345 = vector.broadcast %cst_92 : f32 to vector<8x2xf32>
    %346 = arith.mulf %345, %335 : vector<8x2xf32>
    %347 = arith.select %344, %346, %330 : vector<8x2xi1>, vector<8x2xf32>
    %348 = arith.select %338, %342, %347 : vector<8x2xi1>, vector<8x2xf32>
    %c0_93 = arith.constant 0 : index
    %c0_94 = arith.constant 0 : index
    %349 = vector.load %arg17[%c0_93, %c0_94] : memref<8x2xf32, #tpu.memory_space<vmem>>, vector<8x2xf32>
    tpu.vector_store %arg17[%c0_93, %c0_94], %348 {strides = array<i32>} : memref<8x2xf32, #tpu.memory_space<vmem>>, vector<8x2xf32>,
    return
  }
}

</mosaic_0001>

<bundles_post_ra>
// kernel: tpu_custom_call.1
= control target key start
LH: loop header
LB: loop body
LE: loop exit
PB: predicated region body
PF: predicated region fallthrough
CT: control target
= control target key end

     0   :  { %s2355_s0 = inlined_call_operand.vmem [shape: f32[64,4], index: 0, kind: input, shape index: {}]   ;;  %s2356_s1 = inlined_call_operand.hbm [shape: f32[4,32], index: 1, kind: input, shape index: {}]   ;;  %s2357_s2 = inlined_call_operand.hbm [shape: f32[4,32], index: 2, kind: input, shape index: {}]   ;;  %s2358_s3 = inlined_call_operand.hbm [shape: f32[4,32], index: 3, kind: input, shape index: {}]   ;;  %s2359_s4 = inlined_call_operand.vmem [shape: f32[32,32], index: 4, kind: input, shape index: {}]   ;;  %s2360_s5 = inlined_call_operand.vmem [shape: f32[32,32], index: 5, kind: input, shape index: {}]   ;;  %s2361_s6 = inlined_call_operand.vmem [shape: f32[32,32], index: 6, kind: input, shape index: {}]   ;;  %s2362_s7 = inlined_call_operand.vmem [shape: f32[1,32], index: 7, kind: input, shape index: {}]   ;;  %s2363_s8 = inlined_call_operand.vmem [shape: f32[1,32], index: 8, kind: input, shape index: {}]   ;;  %s2364_s9 = inlined_call_operand.vmem [shape: f32[1,32], index: 9, kind: input, shape index: {}]   ;;  %s2365_s10 = inlined_call_operand.vmem [shape: f32[1,32], index: 10, kind: input, shape index: {}]   ;;  %s2366_s11 = inlined_call_operand.hbm [shape: f32[32,32], index: 11, kind: input, shape index: {}]   ;;  %s2367_s12 = inlined_call_operand.hbm [shape: f32[32,32], index: 12, kind: input, shape index: {}]   ;;  %s2368_s13 = inlined_call_operand.vmem [shape: f32[1,32], index: 13, kind: input, shape index: {}]   ;;  %s2369_s14 = inlined_call_operand.vmem [shape: f32[1,32], index: 14, kind: input, shape index: {}]   ;;  %s2370_s15 = inlined_call_operand.vmem [shape: f32[32,2], index: 15, kind: input, shape index: {}]   ;;  %s2371_s16 = inlined_call_operand.vmem [shape: f32[1,2], index: 16, kind: input, shape index: {}]   ;;  %s2372_s17 = inlined_call_operand.vmem [shape: f32[8,2], index: 17, kind: output, shape index: {}]  }
   0x1   :  { %2374 = sst [smem:[#allocation13_spill]] %s2355_s0 }
   0x2   :  { %2375 = sst [smem:[#allocation14_spill]] %s2356_s1 }
   0x3   :  { %2376 = sst [smem:[#allocation15_spill]] %s2372_s17 }
   0x4   :  { %22 = vsyncpa [#allocation3], 0 }
   0x5   :  { %23 = vsyncpa [#allocation5], 0  ;;  %s43_s26 = sshll.u32 %s2357_s2, 4  ;;  %s44_s26 = int_to_ptr.hbm [resolvable:$true] %s43_s26 }
   0x6   :  { %24 = vsyncpa [#allocation8], 0  ;;  %s1801_s27 = smov [#allocation4]   ;;  %s78_s30 = sshll.u32 %s2366_s11, 4  ;;  %s79_s30 = int_to_ptr.hbm [resolvable:$true] %s78_s30 }
   0x7   :  { %s45_s28 = sshll.u32 %s1801_s27, 4  ;;  %s1802_s18 = smov [#allocation7]   ;;  %s46_s28 = int_to_ptr.vmem [resolvable:$true] %s45_s28 }
   0x8   :  { %48 = dma.hbm_to_vmem [thread:$0]  %s44_s26, 64, %s46_s28, [#allocation5]  }
   0x9   :  { %s80_s19 = sshll.u32 %s1802_s18, 4  ;;  %s1803_s1 = smov 128   ;;  %s81_s19 = int_to_ptr.vmem [resolvable:$true] %s80_s19 }
   0xa   :  { %s1804_s20 = smov 8   ;;  %s2377_s2 = sld [smem:[#allocation14_spill]] }
   0xb   :  { %86 = dma.hbm_to_vmem [thread:$0]  %s79_s30, 512, %s81_s19, [#allocation8], %s1803_s1, %s1803_s1, %s1804_s20  }
   0xc   :  { %s1805_s24 = smov [#allocation2]   ;;  %s54_s11 = sshll.u32 %s2358_s3, 4  ;;  %s55_s11 = int_to_ptr.hbm [resolvable:$true] %s54_s11 }
   0xd   :  { %s34_s25 = sshll.u32 %s1805_s24, 4  ;;  %s1806_s26 = smov [#allocation6]   ;;  %s35_s25 = int_to_ptr.vmem [resolvable:$true] %s34_s25 }
   0xe   :  { %s56_s28 = sshll.u32 %s1806_s26, 4  ;;  %s91_s30 = sshll.u32 %s2367_s12, 4  ;;  %s57_s28 = int_to_ptr.vmem [resolvable:$true] %s56_s28  ;;  %s92_s30 = int_to_ptr.hbm [resolvable:$true] %s91_s30 }
   0xf   :  { %59 = dma.hbm_to_vmem [thread:$0]  %s55_s11, 64, %s57_s28, [#allocation5]  }
  0x10   :  { %s32_s23 = sshll.u32 %s2377_s2, 4  ;;  %s1807_s18 = smov [#allocation9]   ;;  %s33_s23 = int_to_ptr.hbm [resolvable:$true] %s32_s23 }
  0x11   :  { %37 = dma.hbm_to_vmem [thread:$0]  %s33_s23, 64, %s35_s25, [#allocation3]  }
  0x12   :  { %s93_s19 = sshll.u32 %s1807_s18, 4  ;;  %s94_s19 = int_to_ptr.vmem [resolvable:$true] %s93_s19 }
  0x13   :  { %99 = dma.hbm_to_vmem [thread:$0]  %s92_s30, 512, %s94_s19, [#allocation8], %s1803_s1, %s1803_s1, %s1804_s20  }
  0x14   :  { %1795 = dma.done.wait [#allocation3], 64  }
  0x15   :  { %1796 = vsyncadd [#allocation3], 4294967232 }
  0x16   :  { %1797 = dma.done.wait [#allocation5], 128  }
  0x17   :  { %1798 = vsyncadd [#allocation5], 4294967168 }
  0x18   :  { %1799 = dma.done.wait [#allocation8], 1024  }
  0x19   :  { %1800 = vsyncadd [#allocation8], 4294966272  ;;  %vm166_vm0 = vcmask 1043456   ;;  %vm141_vm1 = vcmask 31744   ;;  %v136_v0 = vld [vmem:[#allocation2] sm:$0xf] }
  0x1a   :  { %v211_v1 = vld [vmem:[#allocation4] sm:$0xf]  ;;  %s2378_s12 = sld [smem:[#allocation13_spill]]  ;;  %1463 = vmatpush.msk.msra.mxu0 %vm166_vm0, %v136_v0  ;;  %v1933_v4 = vld [vmem:[%s2359_s4 + $0x18] sm:$0xff]  ;;  %v1940_v5 = vld [vmem:[%s2359_s4 + $0x10] sm:$0xff]  ;;  %v1808_v23 = vmov 0.0  }
  0x1b   :  { %1541 = vmatpush.msk.msra.mxu3 %vm166_vm0, %v211_v1  ;;  %v1948_v7 = vld [vmem:[%s2359_s4 + $0x8] sm:$0xff]  ;;  %1540 = vmatpush.msk.msra.mxu2 %vm166_vm0, %v211_v1  ;;  %v1961_v9 = vld [vmem:[%s2359_s4] sm:$0xff]  ;;  %v1976_v11 = vld [vmem:[%s2360_s5 + $0x18] sm:$0xff]  ;;  %vm322_vm10 = vcmask 261120   ;;  %s2379_s28 = sld [smem:[#allocation15_spill]] }
  0x1c   :  { %1472 = vmatpush.msk.msrb.mxu0 %vm166_vm0, %v211_v1  ;;  %1539 = vmatpush.msk.msra.mxu1 %vm166_vm0, %v211_v1  ;;  %v1986_v12 = vld [vmem:[%s2360_s5 + $0x10] sm:$0xff]  ;;  %v1991_v13 = vld [vmem:[%s2361_s6 + $0x18] sm:$0xff]  ;;  %v1998_v14 = vld [vmem:[%s2360_s5 + $0x8] sm:$0xff] }
  0x1d   :  { %338 = vmatpush.msrb.mxu3 %v1933_v4  ;;  %v2003_v15 = vld [vmem:[%s2361_s6 + $0x10] sm:$0xff]  ;;  %v2014_v17 = vld [vmem:[%s2360_s5] sm:$0xff]  ;;  %v2029_v19 = vld [vmem:[%s2361_s6 + $0x8] sm:$0xff] }
  0x1e   :  { %671 = vmatpush.msrb.mxu1 %v1933_v4  ;;  %v260_v20 = vld [vmem:[#allocation6] sm:$0xf]  ;;  %v2036_v21 = vld [vmem:[%s2361_s6] sm:$0xff] }
  0x1f   :  { %339 = vmatpush.msrb.mxu3 %v1940_v5  ;;  %1481 = vmatpush.msk.msrb.mxu2 %vm166_vm0, %v260_v20  ;;  %v1550_v26 = vld [vmem:[%s2362_s7] ss:$0 sm:$0xff] }
  0x20   :  { %v1917_v2 = vld [vmem:[%s2378_s12] sm:$0xff]  ;;  %v1924_v3 = vld [vmem:[%s2378_s12 + $0x28] sm:$0xff]  ;;  %v1969_v10 = vld [vmem:[%s2378_s12 + $0x30] sm:$0xff]  ;;  %672 = vmatpush.msrb.mxu1 %v1940_v5 }
  0x21   :  { %1464 = vmatmul.msk.f32.vlgmr.msra.gmra.mxu0 %vm141_vm1, %v1917_v2  ;;  %1478 = vmatmul.msk.f32.vlgmr.msra.gmra.mxu3 %vm141_vm1, %v1924_v3  ;;  %v129_v6 = vld [vmem:[%s2378_s12 + $0x8] sm:$0xff]  ;;  %v1953_v8 = vld [vmem:[%s2378_s12 + $0x20] sm:$0xff]  ;;  %v130_v16 = vld [vmem:[%s2378_s12 + $0x10] sm:$0xff] }
  0x22   :  { %1477 = vmatmul.msk.f32.vlgmr.msra.gmra.mxu2 %vm141_vm1, %v1953_v8  ;;  %1474 = vmatmul.msk.f32.vlgmr.msra.gmra.mxu1 %vm141_vm1, %v129_v6  ;;  %v135_v18 = vld [vmem:[%s2378_s12 + $0x38] sm:$0xff]  ;;  %v2118_v51 = vld [vmem:[%s2363_s8] ss:$0 sm:$0xff] }
  0x23   :  { %340 = vmatpush.msrb.mxu3 %v1948_v7  ;;  %641 = vmatpush.msra.mxu0 %v1991_v13  ;;  %v131_v22 = vld [vmem:[%s2378_s12 + $0x18] sm:$0xff]  ;;  %v2126_v63 = vld [vmem:[%s2365_s10] ss:$0 sm:$0xff] }
  0x24   :  { %673 = vmatpush.msrb.mxu1 %v1948_v7  ;;  %691 = vmatpush.msra.mxu2 %v1976_v11 }
  0x25   :  { %341 = vmatpush.msrb.mxu3 %v1961_v9  ;;  %642 = vmatpush.msra.mxu0 %v2003_v15 }
  0x26   :  { %674 = vmatpush.msrb.mxu1 %v1961_v9  ;;  %692 = vmatpush.msra.mxu2 %v1986_v12 }
  0x27   :  { %358 = vmatpush.msra.mxu3 %v1976_v11  ;;  %643 = vmatpush.msra.mxu0 %v2029_v19 }
  0x28   :  { %801 = vmatpush.msra.mxu1 %v1976_v11  ;;  %693 = vmatpush.msra.mxu2 %v1998_v14 }
  0x29   :  { %1465 = vmatmul.msk.f32.gmra.mxu0 %vm141_vm1, %v129_v6  ;;  %1479 = vmatmul.msk.f32.gmra.mxu3 %vm141_vm1, %v1969_v10 }
  0x2a   :  { %359 = vmatpush.msra.mxu3 %v1986_v12  ;;  %1475 = vmatmul.msk.f32.gmra.mxu1 %vm141_vm1, %v130_v16 }
  0x2b   :  { %1482 = vmatmul.msk.f32.vlgmr.msrb.gmra.mxu2 %vm141_vm1, %v1917_v2  ;;  %802 = vmatpush.msra.mxu1 %v1986_v12 }
  0x2c   :  { %360 = vmatpush.msra.mxu3 %v1998_v14  ;;  %644 = vmatpush.msra.mxu0 %v2036_v21 }
  0x2d   :  { %803 = vmatpush.msra.mxu1 %v1998_v14  ;;  %694 = vmatpush.msra.mxu2 %v2014_v17 }
  0x2e   :  { %361 = vmatpush.msra.mxu3 %v2014_v17 }
  0x2f   :  { %804 = vmatpush.msra.mxu1 %v2014_v17  ;;  %861 = vmatpush.msrb.mxu2 %v1991_v13 }
  0x31   :  { %1466 = vmatmul.msk.f32.gmra.mxu0 %vm141_vm1, %v130_v16  ;;  %1480 = vmatmul.msk.f32.gmra.mxu3 %vm141_vm1, %v135_v18 }
  0x32   :  { %1476 = vmatmul.msk.f32.gmra.mxu1 %vm141_vm1, %v131_v22  ;;  %862 = vmatpush.msrb.mxu2 %v2003_v15 }
  0x33   :  { %1483 = vmatmul.msk.f32.gmra.mxu2 %vm141_vm1, %v129_v6 }
  0x34   :  { %863 = vmatpush.msrb.mxu2 %v2029_v19 }
  0x36   :  { %864 = vmatpush.msrb.mxu2 %v2036_v21 }
  0x39   :  { %1467 = vmatmul.msk.f32.gmra.mxu0 %vm141_vm1, %v131_v22  ;;  %342 = vmatmul.f32.vlgmr.msrb.gmra.mxu3 %v1808_v23 }
  0x3a   :  { %421 = vmatpush.msrb.mxu3 %v1991_v13 }
  0x3b   :  { %1484 = vmatmul.msk.f32.gmra.mxu2 %vm141_vm1, %v130_v16 }
  0x3c   :  { %422 = vmatpush.msrb.mxu3 %v2003_v15 }
  0x3e   :  { %423 = vmatpush.msrb.mxu3 %v2029_v19 }
  0x40   :  { %424 = vmatpush.msrb.mxu3 %v2036_v21 }
  0x41   :  { %1468 = vmatmul.msk.f32.gmra.mxu0 %vm141_vm1, %v1953_v8  ;;  %362 = vmatmul.f32.vlgmr.msra.gmra.mxu3 %v1808_v23 }
  0x42   :  { %451 = vmatpush.msra.mxu3 %v1933_v4 }
  0x43   :  { %1485 = vmatmul.msk.f32.gmra.mxu2 %vm141_vm1, %v131_v22 }
  0x44   :  { %452 = vmatpush.msra.mxu3 %v1940_v5 }
  0x46   :  { %453 = vmatpush.msra.mxu3 %v1948_v7 }
  0x48   :  { %454 = vmatpush.msra.mxu3 %v1961_v9 }
  0x49   :  { %1469 = vmatmul.msk.f32.gmra.mxu0 %vm141_vm1, %v1924_v3  ;;  %425 = vmatmul.f32.vlgmr.msrb.gmra.mxu3 %v1808_v23 }
  0x4a   :  { %471 = vmatpush.msrb.mxu3 %v1976_v11 }
  0x4b   :  { %1486 = vmatmul.msk.f32.gmra.mxu2 %vm141_vm1, %v1953_v8 }
  0x4c   :  { %472 = vmatpush.msrb.mxu3 %v1986_v12 }
  0x4e   :  { %473 = vmatpush.msrb.mxu3 %v1998_v14 }
  0x50   :  { %474 = vmatpush.msrb.mxu3 %v2014_v17 }
  0x51   :  { %1470 = vmatmul.msk.f32.gmra.mxu0 %vm141_vm1, %v1969_v10 }
  0x53   :  { %1487 = vmatmul.msk.f32.gmra.mxu2 %vm141_vm1, %v1924_v3 }
  0x59   :  { %1471 = vmatmul.msk.f32.gmra.mxu0 %vm141_vm1, %v135_v18 }
  0x5b   :  { %1488 = vmatmul.msk.f32.gmra.mxu2 %vm141_vm1, %v1969_v10  ;;  %v2132_v10 = vld [vmem:[%s2364_s9] ss:$0 sm:$0xff] }
  0x61   :  { %1473 = vmatmul.msk.f32.vlgmr.msrb.gmra.mxu0 %vm141_vm1, %v1917_v2 }
  0x62   :  { %781 = vmatpush.msrb.mxu0 %v1933_v4 }
  0x63   :  { %1489 = vmatmul.msk.f32.gmra.mxu2 %vm141_vm1, %v135_v18 }
  0x64   :  { %782 = vmatpush.msrb.mxu0 %v1940_v5 }
  0x66   :  { %783 = vmatpush.msrb.mxu0 %v1948_v7 }
  0x68   :  { %784 = vmatpush.msrb.mxu0 %v1961_v9 }
  0x9e   :  { %v187_v24 = vpop.f32.mrf.mxu0 }
  0x9f   :  { %v188_v35 = vadd.f32 %v1550_v26, %v187_v24 }
  0xa4   :  { %v2092_v25 = vpop.f32.mrf.mxu3 }
  0xa5   :  { %v2121_v59 = vpop.f32.mrf.mxu2 }
  0xa6   :  { %v190_v27 = vpop.f32.mrf.mxu0 }
  0xa7   :  { %v2097_v28 = vadd.f32 %v1550_v26, %v190_v27 }
  0xac   :  { %v2099_v29 = vpop.f32.mrf.mxu3 }
  0xae   :  { %v193_v30 = vpop.f32.mrf.mxu0  ;;  %v285_v18 = vpop.f32.mrf.mxu2 }
  0xaf   :  { %v2101_v31 = vadd.f32 %v1550_v26, %v193_v30  ;;  %v286_v22 = vadd.f32 %v2132_v10, %v285_v18 }
  0xb4   :  { %v2103_v32 = vpop.f32.mrf.mxu3 }
  0xb6   :  { %v196_v33 = vpop.f32.mrf.mxu0 }
  0xb7   :  { %v2105_v34 = vadd.f32 %v1550_v26, %v196_v33 }
  0xbc   :  { %v343_v36 = vpop.f32.mrf.mxu3 }
  0xbd   :  { %v366_v37 = vadd.f32 %v343_v36, %v188_v35 }
  0xbe   :  { %v199_v38 = vpop.f32.mrf.mxu0 }
  0xbf   :  { %v2107_v39 = vadd.f32 %v1550_v26, %v199_v38  ;;  %v1490_v40 = vmul.f32 -1.442695, %v366_v37 }
  0xc1   :  { %1557 = vpow2.f32 %v1490_v40 }
  0xc4   :  { %v363_v54 = vpop.f32.mrf.mxu3 }
  0xc6   :  { %v202_v41 = vpop.f32.mrf.mxu0 }
  0xc7   :  { %v2109_v42 = vadd.f32 %v1550_v26, %v202_v41  ;;  %v1558_v43 = vpop.eup %1557 }
  0xc8   :  { %v370_v45 = vadd.f32 1.0, %v1558_v43 }
  0xca   :  { %1559 = vrcp.f32 %v370_v45  ;;  %v382_v61 = vand.u32 2147483648, %v370_v45  ;;  %vm376_vm3 = vweird.f32 %v370_v45  ;;  %v380_v62 = vand.u32 2147483647, %v370_v45 }
  0xcc   :  { %v426_v1 = vpop.f32.mrf.mxu3  ;;  %v383_v6 = vor.u32 1.1754944e-38, %v382_v61  ;;  %vm381_vm5 = vcmp.eq.f32.partialorder %v380_v62, 8.507059e+37 }
  0xcd   :  { %v427_v8 = vadd.f32 %v2126_v63, %v426_v1 }
  0xce   :  { %v205_v44 = vpop.f32.mrf.mxu0 }
  0xcf   :  { %v2111_v46 = vadd.f32 %v1550_v26, %v205_v44 }
  0xd0   :  { %v1560_v49 = vpop.eup %1559 }
  0xd1   :  { %v372_v50 = vmul.f32 %v1560_v49, %v370_v45  ;;  %vm377_vm2 = vweird.f32 %v1560_v49 }
  0xd2   :  { %vm378_vm4 = vmor %vm376_vm3, %vm377_vm2 }
  0xd3   :  { %v373_v55 = vsub.f32 1.0, %v372_v50 }
  0xd5   :  { %v374_v58 = vmul.f32 %v1560_v49, %v373_v55 }
  0xd6   :  { %v208_v47 = vpop.f32.mrf.mxu0 }
  0xd7   :  { %v2113_v48 = vadd.f32 %v1550_v26, %v208_v47  ;;  %v375_v60 = vadd.f32 %v1560_v49, %v374_v58 }
  0xd9   :  { %v379_v2 = vsel %vm378_vm4, %v1560_v49, %v375_v60 }
  0xda   :  { %v384_v16 = vsel %vm381_vm5, %v383_v6, %v379_v2 }
  0xdb   :  { %v429_v20 = vmul.f32 %v427_v8, %v384_v16  ;;  %v288_v8 = vpop.f32.mrf.mxu2 }
  0xdd   :  { %v430_v26 = vadd.f32 %v429_v20, %v286_v22 }
  0xde   :  { %v236_v52 = vpop.f32.mrf.mxu0 }
  0xdf   :  { %v237_v53 = vadd.f32 %v2118_v51, %v236_v52  ;;  %v239_v52 = vpop.f32.mrf.mxu1 }
  0xe1   :  { %v386_v56 = vadd.f32 %v363_v54, %v237_v53  ;;  %v240_v54 = vadd.f32 %v2118_v51, %v239_v52 }
  0xe3   :  { %v1491_v57 = vmul.f32 -1.442695, %v386_v56 }
  0xe5   :  { %1561 = vpow2.f32 %v1491_v57 }
  0xeb   :  { %v1562_v0 = vpop.eup %1561 }
  0xec   :  { %v390_v3 = vadd.f32 1.0, %v1562_v0 }
  0xee   :  { %1563 = vrcp.f32 %v390_v3  ;;  %v402_v30 = vand.u32 2147483648, %v390_v3  ;;  %v400_v35 = vand.u32 2147483647, %v390_v3  ;;  %vm396_vm7 = vweird.f32 %v390_v3 }
  0xef   :  { %1565 = vtanh.f32 %v430_v26 }
  0xf0   :  { %v403_v37 = vor.u32 1.1754944e-38, %v402_v30  ;;  %vm401_vm9 = vcmp.eq.f32.partialorder %v400_v35, 8.507059e+37 }
  0xf4   :  { %v1564_v23 = vpop.eup %1563 }
  0xf5   :  { %v392_v24 = vmul.f32 %v1564_v23, %v390_v3  ;;  %vm397_vm6 = vweird.f32 %v1564_v23  ;;  %v1566_v43 = vpop.eup %1565 }
  0xf6   :  { %vm398_vm8 = vmor %vm396_vm7, %vm397_vm6 }
  0xf7   :  { %v393_v27 = vsub.f32 1.0, %v392_v24 }
  0xf9   :  { %v394_v33 = vmul.f32 %v1564_v23, %v393_v27 }
  0xfb   :  { %v395_v36 = vadd.f32 %v1564_v23, %v394_v33 }
  0xfd   :  { %v399_v38 = vsel %vm398_vm8, %v1564_v23, %v395_v36  ;;  %v289_v23 = vadd.f32 %v2132_v10, %v288_v8 }
  0xfe   :  { %v404_v40 = vsel %vm401_vm9, %v403_v37, %v399_v38 }
  0xff   :  { %v432_v41 = vsub.f32 1.0, %v404_v40  ;;  %v434_v45 = vmul.f32 0.0, %v404_v40 }
 0x101   :  { %v433_v44 = vmul.f32 %v1566_v43, %v432_v41 }
 0x103   :  { %v2135_v47 = vadd.f32 %v434_v45, %v433_v44 }
 0x105   :  { %1492 = vmatmul.msk.f32.vlgmr.msra.gmra.mxu3 %vm322_vm10, %v2135_v47 }
 0x106   :  { %531 = vmatpush.msra.mxu3 %v1991_v13 }
 0x108   :  { %532 = vmatpush.msra.mxu3 %v2003_v15 }
 0x10a   :  { %533 = vmatpush.msra.mxu3 %v2029_v19 }
 0x10c   :  { %534 = vmatpush.msra.mxu3 %v2036_v21 }
 0x10d   :  { %1493 = vmatmul.msk.f32.vlgmr.msrb.gmra.mxu3 %vm322_vm10, %v2135_v47 }
 0x10e   :  { %561 = vmatpush.msrb.mxu3 %v1933_v4 }
 0x110   :  { %562 = vmatpush.msrb.mxu3 %v1940_v5 }
 0x112   :  { %563 = vmatpush.msrb.mxu3 %v1948_v7 }
 0x114   :  { %564 = vmatpush.msrb.mxu3 %v1961_v9 }
 0x115   :  { %1496 = vmatmul.msk.f32.vlgmr.msra.gmra.mxu3 %vm322_vm10, %v2135_v47 }
 0x116   :  { %581 = vmatpush.msra.mxu3 %v1976_v11 }
 0x118   :  { %582 = vmatpush.msra.mxu3 %v1986_v12 }
 0x11a   :  { %583 = vmatpush.msra.mxu3 %v1998_v14 }
 0x11c   :  { %584 = vmatpush.msra.mxu3 %v2014_v17 }
 0x188   :  { %v456_v49 = vpop.f32.mrf.mxu3 }
 0x189   :  { %v479_v50 = vadd.f32 %v456_v49, %v2097_v28 }
 0x18b   :  { %v1494_v53 = vmul.f32 -1.442695, %v479_v50 }
 0x18d   :  { %1567 = vpow2.f32 %v1494_v53 }
 0x190   :  { %v476_v55 = vpop.f32.mrf.mxu3 }
 0x191   :  { %v499_v56 = vadd.f32 %v476_v55, %v240_v54 }
 0x193   :  { %v1568_v57 = vpop.eup %1567  ;;  %v1495_v58 = vmul.f32 -1.442695, %v499_v56 }
 0x194   :  { %v483_v60 = vadd.f32 1.0, %v1568_v57  ;;  %v242_v57 = vpop.f32.mrf.mxu1 }
 0x195   :  { %1569 = vpow2.f32 %v1495_v58 }
 0x196   :  { %1571 = vrcp.f32 %v483_v60  ;;  %v495_v3 = vand.u32 2147483648, %v483_v60  ;;  %v493_v6 = vand.u32 2147483647, %v483_v60  ;;  %vm489_vm12 = vweird.f32 %v483_v60 }
 0x198   :  { %v536_v16 = vpop.f32.mrf.mxu3  ;;  %v496_v22 = vor.u32 1.1754944e-38, %v495_v3  ;;  %vm494_vm14 = vcmp.eq.f32.partialorder %v493_v6, 8.507059e+37 }
 0x199   :  { %v537_v27 = vadd.f32 %v2126_v63, %v536_v16 }
 0x19b   :  { %v1570_v61 = vpop.eup %1569 }
 0x19c   :  { %v1572_v62 = vpop.eup %1571  ;;  %v503_v0 = vadd.f32 1.0, %v1570_v61 }
 0x19d   :  { %v485_v1 = vmul.f32 %v1572_v62, %v483_v60  ;;  %vm490_vm11 = vweird.f32 %v1572_v62  ;;  %v243_v60 = vadd.f32 %v2118_v51, %v242_v57 }
 0x19e   :  { %1573 = vrcp.f32 %v503_v0  ;;  %vm491_vm13 = vmor %vm489_vm12, %vm490_vm11  ;;  %v515_v36 = vand.u32 2147483648, %v503_v0  ;;  %v513_v38 = vand.u32 2147483647, %v503_v0  ;;  %vm509_vm0 = vweird.f32 %v503_v0 }
 0x19f   :  { %v486_v2 = vsub.f32 1.0, %v485_v1 }
 0x1a0   :  { %v516_v43 = vor.u32 1.1754944e-38, %v515_v36  ;;  %vm514_vm2 = vcmp.eq.f32.partialorder %v513_v38, 8.507059e+37 }
 0x1a1   :  { %v487_v28 = vmul.f32 %v1572_v62, %v486_v2 }
 0x1a3   :  { %v488_v18 = vadd.f32 %v1572_v62, %v487_v28 }
 0x1a4   :  { %v1574_v20 = vpop.eup %1573 }
 0x1a5   :  { %v505_v24 = vmul.f32 %v1574_v20, %v503_v0  ;;  %v492_v26 = vsel %vm491_vm13, %v1572_v62, %v488_v18  ;;  %vm510_vm15 = vweird.f32 %v1574_v20 }
 0x1a6   :  { %v497_v30 = vsel %vm494_vm14, %v496_v22, %v492_v26  ;;  %vm511_vm1 = vmor %vm509_vm0, %vm510_vm15 }
 0x1a7   :  { %v506_v33 = vsub.f32 1.0, %v505_v24  ;;  %v539_v35 = vmul.f32 %v537_v27, %v497_v30 }
 0x1a9   :  { %v507_v37 = vmul.f32 %v1574_v20, %v506_v33  ;;  %v540_v40 = vadd.f32 %v539_v35, %v289_v23  ;;  %v291_v23 = vpop.f32.mrf.mxu2 }
 0x1aa   :  { %v292_v35 = vadd.f32 %v2132_v10, %v291_v23 }
 0x1ab   :  { %v508_v41 = vadd.f32 %v1574_v20, %v507_v37  ;;  %1575 = vtanh.f32 %v540_v40 }
 0x1ad   :  { %v512_v44 = vsel %vm511_vm1, %v1574_v20, %v508_v41 }
 0x1ae   :  { %v517_v45 = vsel %vm514_vm2, %v516_v43, %v512_v44 }
 0x1af   :  { %v542_v49 = vsub.f32 1.0, %v517_v45  ;;  %v544_v53 = vmul.f32 %v517_v45, %v2135_v47 }
 0x1b1   :  { %v1576_v50 = vpop.eup %1575 }
 0x1b2   :  { %v543_v52 = vmul.f32 %v1576_v50, %v542_v49 }
 0x1b4   :  { %v2160_v54 = vadd.f32 %v544_v53, %v543_v52 }
 0x1b6   :  { %1497 = vmatmul.msk.f32.vlgmr.msrb.gmra.mxu3 %vm322_vm10, %v2160_v54  ;;  %1501 = vmatmul.msk.f32.vlgmr.msra.gmra.mxu0 %vm322_vm10, %v2160_v54 }
 0x1b7   :  { %751 = vmatpush.msrb.mxu3 %v1991_v13  ;;  %911 = vmatpush.msra.mxu0 %v1976_v11 }
 0x1b9   :  { %752 = vmatpush.msrb.mxu3 %v2003_v15  ;;  %912 = vmatpush.msra.mxu0 %v1986_v12 }
 0x1bb   :  { %753 = vmatpush.msrb.mxu3 %v2029_v19  ;;  %913 = vmatpush.msra.mxu0 %v1998_v14 }
 0x1bd   :  { %754 = vmatpush.msrb.mxu3 %v2036_v21  ;;  %914 = vmatpush.msra.mxu0 %v2014_v17 }
 0x1be   :  { %1498 = vmatmul.msk.f32.vlgmr.msra.gmra.mxu3 %vm322_vm10, %v2160_v54 }
 0x1bf   :  { %891 = vmatpush.msra.mxu3 %v1933_v4 }
 0x1c1   :  { %892 = vmatpush.msra.mxu3 %v1940_v5 }
 0x1c3   :  { %893 = vmatpush.msra.mxu3 %v1948_v7 }
 0x1c5   :  { %894 = vmatpush.msra.mxu3 %v1961_v9 }
 0x239   :  { %v566_v55 = vpop.f32.mrf.mxu3 }
 0x23a   :  { %v589_v56 = vadd.f32 %v566_v55, %v2101_v31  ;;  %v646_v31 = vpop.f32.mrf.mxu0 }
 0x23b   :  { %v647_v27 = vadd.f32 %v2126_v63, %v646_v31 }
 0x23c   :  { %v1499_v58 = vmul.f32 -1.442695, %v589_v56 }
 0x23e   :  { %1577 = vpow2.f32 %v1499_v58 }
 0x241   :  { %v586_v61 = vpop.f32.mrf.mxu3 }
 0x242   :  { %v609_v62 = vadd.f32 %v586_v61, %v243_v60  ;;  %v294_v61 = vpop.f32.mrf.mxu2 }
 0x244   :  { %v1578_v0 = vpop.eup %1577  ;;  %v1500_v1 = vmul.f32 -1.442695, %v609_v62 }
 0x245   :  { %v593_v2 = vadd.f32 1.0, %v1578_v0 }
 0x246   :  { %1579 = vpow2.f32 %v1500_v1 }
 0x247   :  { %1581 = vrcp.f32 %v593_v2  ;;  %v605_v18 = vand.u32 2147483648, %v593_v2  ;;  %v603_v22 = vand.u32 2147483647, %v593_v2  ;;  %vm599_vm4 = vweird.f32 %v593_v2 }
 0x249   :  { %v606_v30 = vor.u32 1.1754944e-38, %v605_v18  ;;  %vm604_vm6 = vcmp.eq.f32.partialorder %v603_v22, 8.507059e+37 }
 0x24a   :  { %v2205_v62 = vpop.f32.mrf.mxu2 }
 0x24c   :  { %v1580_v3 = vpop.eup %1579 }
 0x24d   :  { %v1582_v28 = vpop.eup %1581  ;;  %v613_v6 = vadd.f32 1.0, %v1580_v3 }
 0x24e   :  { %v595_v8 = vmul.f32 %v1582_v28, %v593_v2  ;;  %vm600_vm3 = vweird.f32 %v1582_v28  ;;  %v245_v2 = vpop.f32.mrf.mxu1 }
 0x24f   :  { %1583 = vrcp.f32 %v613_v6  ;;  %vm601_vm5 = vmor %vm599_vm4, %vm600_vm3  ;;  %v625_v41 = vand.u32 2147483648, %v613_v6  ;;  %v623_v44 = vand.u32 2147483647, %v613_v6  ;;  %vm619_vm8 = vweird.f32 %v613_v6 }
 0x250   :  { %v596_v16 = vsub.f32 1.0, %v595_v8 }
 0x251   :  { %v626_v50 = vor.u32 1.1754944e-38, %v625_v41  ;;  %vm624_vm11 = vcmp.eq.f32.partialorder %v623_v44, 8.507059e+37 }
 0x252   :  { %v597_v20 = vmul.f32 %v1582_v28, %v596_v16  ;;  %v2207_v0 = vpop.f32.mrf.mxu2  ;;  %v246_v16 = vadd.f32 %v2118_v51, %v245_v2 }
 0x254   :  { %v598_v24 = vadd.f32 %v1582_v28, %v597_v20 }
 0x255   :  { %v1584_v26 = vpop.eup %1583 }
 0x256   :  { %v615_v33 = vmul.f32 %v1584_v26, %v613_v6  ;;  %v602_v36 = vsel %vm601_vm5, %v1582_v28, %v598_v24  ;;  %vm620_vm7 = vweird.f32 %v1584_v26 }
 0x257   :  { %v607_v37 = vsel %vm604_vm6, %v606_v30, %v602_v36  ;;  %vm621_vm9 = vmor %vm619_vm8, %vm620_vm7 }
 0x258   :  { %v616_v38 = vsub.f32 1.0, %v615_v33  ;;  %v649_v40 = vmul.f32 %v647_v27, %v607_v37 }
 0x25a   :  { %v617_v43 = vmul.f32 %v1584_v26, %v616_v38  ;;  %v650_v45 = vadd.f32 %v649_v40, %v292_v35  ;;  %v2209_v1 = vpop.f32.mrf.mxu2 }
 0x25c   :  { %v618_v49 = vadd.f32 %v1584_v26, %v617_v43  ;;  %1585 = vtanh.f32 %v650_v45 }
 0x25e   :  { %v622_v52 = vsel %vm621_vm9, %v1584_v26, %v618_v49 }
 0x25f   :  { %v627_v53 = vsel %vm624_vm11, %v626_v50, %v622_v52  ;;  %v295_v50 = vadd.f32 %v2132_v10, %v294_v61 }
 0x260   :  { %v652_v55 = vsub.f32 1.0, %v627_v53  ;;  %v654_v58 = vmul.f32 %v627_v53, %v2160_v54 }
 0x262   :  { %v1586_v56 = vpop.eup %1585  ;;  %v2211_v3 = vpop.f32.mrf.mxu2 }
 0x263   :  { %v653_v57 = vmul.f32 %v1586_v56, %v652_v55 }
 0x265   :  { %v2185_v60 = vadd.f32 %v654_v58, %v653_v57 }
 0x267   :  { %1502 = vmatmul.msk.f32.vlgmr.msrb.gmra.mxu1 %vm322_vm10, %v2185_v60  ;;  %1503 = vmatmul.msk.f32.vlgmr.msra.gmra.mxu2 %vm322_vm10, %v2185_v60 }
 0x268   :  { %1506 = vmatmul.msk.f32.vlgmr.msrb.gmra.mxu3 %vm322_vm10, %v2185_v60  ;;  %971 = vmatpush.msrb.mxu1 %v1991_v13 }
 0x269   :  { %1001 = vmatpush.msra.mxu2 %v1933_v4  ;;  %1021 = vmatpush.msrb.mxu3 %v1976_v11 }
 0x26a   :  { %972 = vmatpush.msrb.mxu1 %v2003_v15 }
 0x26b   :  { %1002 = vmatpush.msra.mxu2 %v1940_v5  ;;  %1022 = vmatpush.msrb.mxu3 %v1986_v12 }
 0x26c   :  { %973 = vmatpush.msrb.mxu1 %v2029_v19 }
 0x26d   :  { %1003 = vmatpush.msra.mxu2 %v1948_v7  ;;  %1023 = vmatpush.msrb.mxu3 %v1998_v14 }
 0x26e   :  { %974 = vmatpush.msrb.mxu1 %v2036_v21 }
 0x26f   :  { %1004 = vmatpush.msra.mxu2 %v1961_v9  ;;  %1024 = vmatpush.msrb.mxu3 %v2014_v17 }
 0x2e4   :  { %v676_v28 = vpop.f32.mrf.mxu1 }
 0x2e5   :  { %v699_v6 = vadd.f32 %v676_v28, %v2105_v34 }
 0x2e7   :  { %v1504_v8 = vmul.f32 -1.442695, %v699_v6 }
 0x2e9   :  { %1587 = vpow2.f32 %v1504_v8 }
 0x2ea   :  { %v696_v18 = vpop.f32.mrf.mxu2 }
 0x2eb   :  { %v719_v31 = vadd.f32 %v696_v18, %v246_v16  ;;  %v756_v38 = vpop.f32.mrf.mxu3 }
 0x2ec   :  { %v757_v49 = vadd.f32 %v2126_v63, %v756_v38 }
 0x2ed   :  { %v1505_v20 = vmul.f32 -1.442695, %v719_v31 }
 0x2ef   :  { %v1588_v22 = vpop.eup %1587  ;;  %1589 = vpow2.f32 %v1505_v20 }
 0x2f0   :  { %v703_v23 = vadd.f32 1.0, %v1588_v22 }
 0x2f2   :  { %1591 = vrcp.f32 %v703_v23  ;;  %v715_v35 = vand.u32 2147483648, %v703_v23  ;;  %v713_v34 = vand.u32 2147483647, %v703_v23  ;;  %vm709_vm13 = vweird.f32 %v703_v23 }
 0x2f4   :  { %v716_v43 = vor.u32 1.1754944e-38, %v715_v35  ;;  %vm714_vm15 = vcmp.eq.f32.partialorder %v713_v34, 8.507059e+37 }
 0x2f5   :  { %v1590_v24 = vpop.eup %1589 }
 0x2f6   :  { %v723_v26 = vadd.f32 1.0, %v1590_v24 }
 0x2f8   :  { %v1592_v27 = vpop.eup %1591  ;;  %1593 = vrcp.f32 %v723_v26  ;;  %v735_v55 = vand.u32 2147483648, %v723_v26  ;;  %v733_v57 = vand.u32 2147483647, %v723_v26  ;;  %vm729_vm1 = vweird.f32 %v723_v26 }
 0x2f9   :  { %v705_v30 = vmul.f32 %v1592_v27, %v703_v23  ;;  %vm710_vm12 = vweird.f32 %v1592_v27 }
 0x2fa   :  { %vm711_vm14 = vmor %vm709_vm13, %vm710_vm12  ;;  %v736_v28 = vor.u32 1.1754944e-38, %v735_v55  ;;  %vm734_vm3 = vcmp.eq.f32.partialorder %v733_v57, 8.507059e+37 }
 0x2fb   :  { %v706_v33 = vsub.f32 1.0, %v705_v30 }
 0x2fd   :  { %v707_v36 = vmul.f32 %v1592_v27, %v706_v33 }
 0x2fe   :  { %v1594_v37 = vpop.eup %1593 }
 0x2ff   :  { %v725_v40 = vmul.f32 %v1594_v37, %v723_v26  ;;  %v708_v41 = vadd.f32 %v1592_v27, %v707_v36  ;;  %vm730_vm0 = vweird.f32 %v1594_v37 }
 0x300   :  { %vm731_vm2 = vmor %vm729_vm1, %vm730_vm0 }
 0x301   :  { %v726_v44 = vsub.f32 1.0, %v725_v40  ;;  %v712_v45 = vsel %vm711_vm14, %v1592_v27, %v708_v41 }
 0x302   :  { %v717_v52 = vsel %vm714_vm15, %v716_v43, %v712_v45 }
 0x303   :  { %v727_v53 = vmul.f32 %v1594_v37, %v726_v44  ;;  %v759_v56 = vmul.f32 %v757_v49, %v717_v52 }
 0x305   :  { %v728_v58 = vadd.f32 %v1594_v37, %v727_v53  ;;  %v760_v2 = vadd.f32 %v759_v56, %v295_v50  ;;  %v298_v50 = vadd.f32 %v2132_v10, %v2205_v62  ;;  %v252_v62 = vadd.f32 %v2118_v51, %v2092_v25 }
 0x307   :  { %v732_v6 = vsel %vm731_vm2, %v1594_v37, %v728_v58  ;;  %1595 = vtanh.f32 %v760_v2 }
 0x308   :  { %v737_v8 = vsel %vm734_vm3, %v736_v28, %v732_v6 }
 0x309   :  { %v762_v16 = vsub.f32 1.0, %v737_v8  ;;  %v764_v61 = vmul.f32 %v737_v8, %v2185_v60 }
 0x30d   :  { %v1596_v18 = vpop.eup %1595 }
 0x30e   :  { %v763_v31 = vmul.f32 %v1596_v18, %v762_v16 }
 0x310   :  { %v2218_v20 = vadd.f32 %v764_v61, %v763_v31 }
 0x312   :  { %1507 = vmatmul.msk.f32.vlgmr.msrb.gmra.mxu0 %vm322_vm10, %v2218_v20  ;;  %1508 = vmatmul.msk.f32.vlgmr.msra.gmra.mxu1 %vm322_vm10, %v2218_v20 }
 0x313   :  { %1511 = vmatmul.msk.f32.vlgmr.msrb.gmra.mxu2 %vm322_vm10, %v2218_v20  ;;  %1081 = vmatpush.msrb.mxu0 %v1991_v13 }
 0x314   :  { %1111 = vmatpush.msra.mxu1 %v1933_v4  ;;  %1131 = vmatpush.msrb.mxu2 %v1976_v11  ;;  %v249_v4 = vadd.f32 %v2118_v51, %v2121_v59 }
 0x315   :  { %1082 = vmatpush.msrb.mxu0 %v2003_v15 }
 0x316   :  { %1112 = vmatpush.msra.mxu1 %v1940_v5  ;;  %1132 = vmatpush.msrb.mxu2 %v1986_v12 }
 0x317   :  { %1083 = vmatpush.msrb.mxu0 %v2029_v19 }
 0x318   :  { %1113 = vmatpush.msra.mxu1 %v1948_v7  ;;  %1133 = vmatpush.msrb.mxu2 %v1998_v14 }
 0x319   :  { %1084 = vmatpush.msrb.mxu0 %v2036_v21 }
 0x31a   :  { %1114 = vmatpush.msra.mxu1 %v1961_v9  ;;  %1134 = vmatpush.msrb.mxu2 %v2014_v17 }
 0x38f   :  { %v786_v11 = vpop.f32.mrf.mxu0  ;;  %v806_v22 = vpop.f32.mrf.mxu1 }
 0x390   :  { %v809_v5 = vadd.f32 %v786_v11, %v2107_v39  ;;  %v829_v12 = vadd.f32 %v806_v22, %v249_v4 }
 0x392   :  { %v1509_v23 = vmul.f32 -1.442695, %v809_v5  ;;  %v1510_v24 = vmul.f32 -1.442695, %v829_v12 }
 0x394   :  { %1597 = vpow2.f32 %v1509_v23 }
 0x395   :  { %1599 = vpow2.f32 %v1510_v24 }
 0x396   :  { %v866_v38 = vpop.f32.mrf.mxu2 }
 0x397   :  { %v867_v44 = vadd.f32 %v2126_v63, %v866_v38 }
 0x39a   :  { %v1598_v7 = vpop.eup %1597 }
 0x39b   :  { %v1600_v14 = vpop.eup %1599  ;;  %v813_v26 = vadd.f32 1.0, %v1598_v7 }
 0x39c   :  { %v833_v27 = vadd.f32 1.0, %v1600_v14 }
 0x39d   :  { %1601 = vrcp.f32 %v813_v26  ;;  %v825_v36 = vand.u32 2147483648, %v813_v26  ;;  %v823_v39 = vand.u32 2147483647, %v813_v26  ;;  %vm819_vm5 = vweird.f32 %v813_v26 }
 0x39e   :  { %1603 = vrcp.f32 %v833_v27  ;;  %v845_v52 = vand.u32 2147483648, %v833_v27  ;;  %vm839_vm9 = vweird.f32 %v833_v27  ;;  %v843_v55 = vand.u32 2147483647, %v833_v27 }
 0x39f   :  { %v826_v41 = vor.u32 1.1754944e-38, %v825_v36  ;;  %vm824_vm7 = vcmp.eq.f32.partialorder %v823_v39, 8.507059e+37  ;;  %v301_v39 = vadd.f32 %v2132_v10, %v2207_v0  ;;  %v255_v0 = vadd.f32 %v2118_v51, %v2099_v29  ;;  %v1237_v29 = vld [vmem:[#allocation9] sm:$0xff] }
 0x3a0   :  { %v846_v58 = vor.u32 1.1754944e-38, %v845_v52  ;;  %vm844_vm12 = vcmp.eq.f32.partialorder %v843_v55, 8.507059e+37 }
 0x3a3   :  { %v1602_v9 = vpop.eup %1601 }
 0x3a4   :  { %v1604_v17 = vpop.eup %1603  ;;  %v815_v30 = vmul.f32 %v1602_v9, %v813_v26  ;;  %vm820_vm4 = vweird.f32 %v1602_v9 }
 0x3a5   :  { %v835_v33 = vmul.f32 %v1604_v17, %v833_v27  ;;  %vm821_vm6 = vmor %vm819_vm5, %vm820_vm4  ;;  %vm840_vm8 = vweird.f32 %v1604_v17 }
 0x3a6   :  { %v816_v59 = vsub.f32 1.0, %v815_v30  ;;  %vm841_vm11 = vmor %vm839_vm9, %vm840_vm8 }
 0x3a7   :  { %v836_v35 = vsub.f32 1.0, %v835_v33 }
 0x3a8   :  { %v817_v34 = vmul.f32 %v1602_v9, %v816_v59 }
 0x3a9   :  { %v837_v37 = vmul.f32 %v1604_v17, %v836_v35 }
 0x3aa   :  { %v818_v40 = vadd.f32 %v1602_v9, %v817_v34 }
 0x3ab   :  { %v838_v45 = vadd.f32 %v1604_v17, %v837_v37 }
 0x3ac   :  { %v822_v43 = vsel %vm821_vm6, %v1602_v9, %v818_v40 }
 0x3ad   :  { %v827_v49 = vsel %vm824_vm7, %v826_v41, %v822_v43  ;;  %v842_v57 = vsel %vm841_vm11, %v1604_v17, %v838_v45 }
 0x3ae   :  { %v869_v53 = vmul.f32 %v867_v44, %v827_v49  ;;  %v847_v2 = vsel %vm844_vm12, %v846_v58, %v842_v57 }
 0x3af   :  { %v872_v28 = vsub.f32 1.0, %v847_v2  ;;  %v874_v16 = vmul.f32 %v847_v2, %v2218_v20 }
 0x3b0   :  { %v870_v56 = vadd.f32 %v869_v53, %v298_v50 }
 0x3b2   :  { %1605 = vtanh.f32 %v870_v56 }
 0x3b8   :  { %v1606_v6 = vpop.eup %1605 }
 0x3b9   :  { %v873_v8 = vmul.f32 %v1606_v6, %v872_v28 }
 0x3bb   :  { %v2245_v18 = vadd.f32 %v874_v16, %v873_v8 }
 0x3bd   :  { %1512 = vmatmul.msk.f32.vlgmr.msra.gmra.mxu3 %vm322_vm10, %v2245_v18  ;;  %1513 = vmatmul.msk.f32.vlgmr.msra.gmra.mxu0 %vm322_vm10, %v2245_v18 }
 0x3be   :  { %1516 = vmatmul.msk.f32.vlgmr.msrb.gmra.mxu1 %vm322_vm10, %v2245_v18  ;;  %1191 = vmatpush.msra.mxu3 %v1991_v13 }
 0x3c0   :  { %1192 = vmatpush.msra.mxu3 %v2003_v15 }
 0x3c2   :  { %1193 = vmatpush.msra.mxu3 %v2029_v19 }
 0x3c4   :  { %1194 = vmatpush.msra.mxu3 %v2036_v21 }
 0x43a   :  { %v916_v31 = vpop.f32.mrf.mxu0 }
 0x43b   :  { %v939_v61 = vadd.f32 %v916_v31, %v252_v62 }
 0x43d   :  { %v1515_v4 = vmul.f32 -1.442695, %v939_v61  ;;  %v1240_v61 = vld [vmem:[#allocation9 + $0x18] sm:$0xff] }
 0x43e   :  { %1253 = vmatpush.msrb.mxu1 %v1240_v61 }
 0x43f   :  { %1607 = vpow2.f32 %v1515_v4  ;;  %v1239_v4 = vld [vmem:[#allocation9 + $0x10] sm:$0xff] }
 0x440   :  { %v896_v11 = vpop.f32.mrf.mxu3  ;;  %1254 = vmatpush.msrb.mxu1 %v1239_v4 }
 0x441   :  { %v919_v22 = vadd.f32 %v896_v11, %v2109_v42  ;;  %v976_v42 = vpop.f32.mrf.mxu1  ;;  %v1238_v11 = vld [vmem:[#allocation9 + $0x8] sm:$0xff] }
 0x442   :  { %v977_v59 = vadd.f32 %v2126_v63, %v976_v42  ;;  %1255 = vmatpush.msrb.mxu1 %v1238_v11  ;;  %v304_v42 = vadd.f32 %v2132_v10, %v2209_v1 }
 0x443   :  { %v1514_v5 = vmul.f32 -1.442695, %v919_v22 }
 0x444   :  { %1256 = vmatpush.msrb.mxu1 %v1237_v29 }
 0x445   :  { %v1608_v12 = vpop.eup %1607  ;;  %1609 = vpow2.f32 %v1514_v5 }
 0x446   :  { %v943_v13 = vadd.f32 1.0, %v1608_v12 }
 0x448   :  { %1611 = vrcp.f32 %v943_v13  ;;  %v955_v37 = vand.u32 2147483648, %v943_v13  ;;  %vm949_vm2 = vweird.f32 %v943_v13  ;;  %v953_v40 = vand.u32 2147483647, %v943_v13 }
 0x44a   :  { %v956_v44 = vor.u32 1.1754944e-38, %v955_v37  ;;  %vm954_vm4 = vcmp.eq.f32.partialorder %v953_v40, 8.507059e+37 }
 0x44b   :  { %v1610_v15 = vpop.eup %1609 }
 0x44c   :  { %v923_v23 = vadd.f32 1.0, %v1610_v15 }
 0x44e   :  { %1613 = vrcp.f32 %v923_v23  ;;  %v1612_v19 = vpop.eup %1611  ;;  %v935_v26 = vand.u32 2147483648, %v923_v23  ;;  %v933_v9 = vand.u32 2147483647, %v923_v23  ;;  %vm929_vm14 = vweird.f32 %v923_v23 }
 0x44f   :  { %v945_v21 = vmul.f32 %v1612_v19, %v943_v13  ;;  %vm950_vm1 = vweird.f32 %v1612_v19 }
 0x450   :  { %v936_v33 = vor.u32 1.1754944e-38, %v935_v26  ;;  %vm934_vm0 = vcmp.eq.f32.partialorder %v933_v9, 8.507059e+37  ;;  %vm951_vm3 = vmor %vm949_vm2, %vm950_vm1 }
 0x451   :  { %v946_v25 = vsub.f32 1.0, %v945_v21 }
 0x453   :  { %v947_v17 = vmul.f32 %v1612_v19, %v946_v25 }
 0x454   :  { %v1614_v24 = vpop.eup %1613 }
 0x455   :  { %v925_v7 = vmul.f32 %v1614_v24, %v923_v23  ;;  %vm930_vm13 = vweird.f32 %v1614_v24  ;;  %v948_v36 = vadd.f32 %v1612_v19, %v947_v17 }
 0x456   :  { %vm931_vm15 = vmor %vm929_vm14, %vm930_vm13 }
 0x457   :  { %v926_v14 = vsub.f32 1.0, %v925_v7  ;;  %v952_v43 = vsel %vm951_vm3, %v1612_v19, %v948_v36 }
 0x458   :  { %v957_v45 = vsel %vm954_vm4, %v956_v44, %v952_v43 }
 0x459   :  { %v927_v27 = vmul.f32 %v1614_v24, %v926_v14  ;;  %v982_v49 = vsub.f32 1.0, %v957_v45  ;;  %v984_v53 = vmul.f32 %v957_v45, %v2245_v18 }
 0x45b   :  { %v928_v30 = vadd.f32 %v1614_v24, %v927_v27 }
 0x45d   :  { %v932_v35 = vsel %vm931_vm15, %v1614_v24, %v928_v30 }
 0x45e   :  { %v937_v34 = vsel %vm934_vm0, %v936_v33, %v932_v35 }
 0x45f   :  { %v979_v38 = vmul.f32 %v977_v59, %v937_v34 }
 0x461   :  { %v980_v41 = vadd.f32 %v979_v38, %v301_v39 }
 0x463   :  { %1615 = vtanh.f32 %v980_v41 }
 0x469   :  { %v1616_v50 = vpop.eup %1615 }
 0x46a   :  { %v983_v52 = vmul.f32 %v1616_v50, %v982_v49  ;;  %v258_v49 = vadd.f32 %v2118_v51, %v2103_v32 }
 0x46c   :  { %v2264_v55 = vadd.f32 %v984_v53, %v983_v52  ;;  %v1209_v53 = vld [vmem:[#allocation7 + $0x18] sm:$0xff] }
 0x46d   :  { %1229 = vmatpush.msra.mxu0 %v1209_v53 }
 0x46e   :  { %1517 = vmatmul.msk.f32.vlgmr.msra.gmra.mxu2 %vm322_vm10, %v2264_v55  ;;  %1518 = vmatmul.msk.f32.vlgmr.msrb.gmra.mxu3 %vm322_vm10, %v2264_v55 }
 0x46f   :  { %1521 = vmatmul.msk.f32.vlgmr.msrb.gmra.mxu0 %vm322_vm10, %v2264_v55 }
 0x4ec   :  { %v1086_v24 = vpop.f32.mrf.mxu0 }
 0x4ed   :  { %v1087_v26 = vadd.f32 %v2126_v63, %v1086_v24 }
 0x4f1   :  { %v1006_v56 = vpop.f32.mrf.mxu2  ;;  %v1026_v57 = vpop.f32.mrf.mxu3 }
 0x4f2   :  { %v1029_v58 = vadd.f32 %v1006_v56, %v2111_v46  ;;  %v1049_v2 = vadd.f32 %v1026_v57, %v255_v0  ;;  %v1208_v56 = vld [vmem:[#allocation7 + $0x10] sm:$0xff]  ;;  %v1207_v57 = vld [vmem:[#allocation7 + $0x8] sm:$0xff] }
 0x4f3   :  { %1230 = vmatpush.msra.mxu0 %v1208_v56 }
 0x4f4   :  { %v1519_v28 = vmul.f32 -1.442695, %v1029_v58  ;;  %v1520_v6 = vmul.f32 -1.442695, %v1049_v2  ;;  %v1206_v2 = vld [vmem:[#allocation7] sm:$0xff] }
 0x4f5   :  { %1231 = vmatpush.msra.mxu0 %v1207_v57 }
 0x4f6   :  { %1617 = vpow2.f32 %v1519_v28 }
 0x4f7   :  { %1619 = vpow2.f32 %v1520_v6  ;;  %1232 = vmatpush.msra.mxu0 %v1206_v2 }
 0x4fc   :  { %v1618_v8 = vpop.eup %1617 }
 0x4fd   :  { %v1620_v16 = vpop.eup %1619  ;;  %v1033_v62 = vadd.f32 1.0, %v1618_v8 }
 0x4fe   :  { %v1053_v31 = vadd.f32 1.0, %v1620_v16 }
 0x4ff   :  { %1621 = vrcp.f32 %v1033_v62  ;;  %v1045_v15 = vand.u32 2147483648, %v1033_v62  ;;  %v1043_v21 = vand.u32 2147483647, %v1033_v62  ;;  %vm1039_vm6 = vweird.f32 %v1033_v62 }
 0x500   :  { %1623 = vrcp.f32 %v1053_v31  ;;  %v1065_v33 = vand.u32 2147483648, %v1053_v31  ;;  %vm1059_vm11 = vweird.f32 %v1053_v31  ;;  %v1063_v59 = vand.u32 2147483647, %v1053_v31 }
 0x501   :  { %v1046_v14 = vor.u32 1.1754944e-38, %v1045_v15  ;;  %vm1044_vm8 = vcmp.eq.f32.partialorder %v1043_v21, 8.507059e+37 }
 0x502   :  { %v1066_v34 = vor.u32 1.1754944e-38, %v1065_v33  ;;  %vm1064_vm13 = vcmp.eq.f32.partialorder %v1063_v59, 8.507059e+37 }
 0x505   :  { %v1622_v22 = vpop.eup %1621 }
 0x506   :  { %v1624_v46 = vpop.eup %1623  ;;  %v1035_v5 = vmul.f32 %v1622_v22, %v1033_v62  ;;  %vm1040_vm5 = vweird.f32 %v1622_v22 }
 0x507   :  { %v1055_v12 = vmul.f32 %v1624_v46, %v1053_v31  ;;  %vm1041_vm7 = vmor %vm1039_vm6, %vm1040_vm5  ;;  %vm1060_vm9 = vweird.f32 %v1624_v46 }
 0x508   :  { %v1036_v13 = vsub.f32 1.0, %v1035_v5  ;;  %vm1061_vm12 = vmor %vm1059_vm11, %vm1060_vm9 }
 0x509   :  { %v1056_v23 = vsub.f32 1.0, %v1055_v12 }
 0x50a   :  { %v1037_v19 = vmul.f32 %v1622_v22, %v1036_v13  ;;  %v307_v13 = vadd.f32 %v2132_v10, %v2211_v3 }
 0x50b   :  { %v1057_v7 = vmul.f32 %v1624_v46, %v1056_v23 }
 0x50c   :  { %v1038_v25 = vadd.f32 %v1622_v22, %v1037_v19 }
 0x50d   :  { %v1058_v17 = vadd.f32 %v1624_v46, %v1057_v7 }
 0x50e   :  { %v1042_v27 = vsel %vm1041_vm7, %v1622_v22, %v1038_v25 }
 0x50f   :  { %v1047_v9 = vsel %vm1044_vm8, %v1046_v14, %v1042_v27  ;;  %v1062_v36 = vsel %vm1061_vm12, %v1624_v46, %v1058_v17 }
 0x510   :  { %v1089_v30 = vmul.f32 %v1087_v26, %v1047_v9  ;;  %v1067_v39 = vsel %vm1064_vm13, %v1066_v34, %v1062_v36  ;;  %v1554_v34 = vld [vmem:[%s2368_s13] ss:$0 sm:$0xff] }
 0x511   :  { %v1092_v37 = vsub.f32 1.0, %v1067_v39  ;;  %v1094_v41 = vmul.f32 %v1067_v39, %v2264_v55 }
 0x512   :  { %v1090_v35 = vadd.f32 %v1089_v30, %v304_v42 }
 0x514   :  { %1625 = vtanh.f32 %v1090_v35 }
 0x51a   :  { %v1626_v38 = vpop.eup %1625 }
 0x51b   :  { %v1093_v40 = vmul.f32 %v1626_v38, %v1092_v37 }
 0x51d   :  { %v2279_v43 = vadd.f32 %v1094_v41, %v1093_v40 }
 0x51f   :  { %1522 = vmatmul.msk.f32.vlgmr.msra.gmra.mxu1 %vm322_vm10, %v2279_v43  ;;  %1523 = vmatmul.msk.f32.vlgmr.msrb.gmra.mxu2 %vm322_vm10, %v2279_v43 }
 0x520   :  { %1526 = vmatmul.msk.f32.vlgmr.msra.gmra.mxu3 %vm322_vm10, %v2279_v43 }
 0x527   :  { %1528 = vmatmul.msk.f32.vlgmr.msrb.gmra.mxu1 %vm322_vm10, %v2135_v47 }
 0x52f   :  { %1529 = vmatmul.msk.f32.gmra.mxu1 %vm322_vm10, %v2160_v54 }
 0x537   :  { %1530 = vmatmul.msk.f32.gmra.mxu1 %vm322_vm10, %v2185_v60 }
 0x53f   :  { %1531 = vmatmul.msk.f32.gmra.mxu1 %vm322_vm10, %v2218_v20 }
 0x547   :  { %1532 = vmatmul.msk.f32.gmra.mxu1 %vm322_vm10, %v2245_v18 }
 0x54f   :  { %1533 = vmatmul.msk.f32.gmra.mxu1 %vm322_vm10, %v2264_v55 }
 0x557   :  { %1534 = vmatmul.msk.f32.gmra.mxu1 %vm322_vm10, %v2279_v43 }
 0x59c   :  { %v1116_v1 = vpop.f32.mrf.mxu1 }
 0x59d   :  { %v1139_v44 = vadd.f32 %v1116_v1, %v2113_v48 }
 0x59f   :  { %v1524_v45 = vmul.f32 -1.442695, %v1139_v44 }
 0x5a1   :  { %1627 = vpow2.f32 %v1524_v45 }
 0x5a2   :  { %v1136_v50 = vpop.f32.mrf.mxu2 }
 0x5a3   :  { %v1159_v52 = vadd.f32 %v1136_v50, %v258_v49  ;;  %v1196_v4 = vpop.f32.mrf.mxu3  ;;  %v1555_v50 = vld [vmem:[%s2369_s14] ss:$0 sm:$0xff] }
 0x5a4   :  { %v1197_v12 = vadd.f32 %v2126_v63, %v1196_v4  ;;  %v1258_v42 = vpop.f32.mrf.mxu1 }
 0x5a5   :  { %v1525_v0 = vmul.f32 -1.442695, %v1159_v52 }
 0x5a7   :  { %v1628_v58 = vpop.eup %1627  ;;  %1629 = vpow2.f32 %v1525_v0 }
 0x5a8   :  { %v1143_v28 = vadd.f32 1.0, %v1628_v58 }
 0x5aa   :  { %1631 = vrcp.f32 %v1143_v28  ;;  %v1155_v16 = vand.u32 2147483648, %v1143_v28  ;;  %v1153_v31 = vand.u32 2147483647, %v1143_v28  ;;  %vm1149_vm15 = vweird.f32 %v1143_v28 }
 0x5ac   :  { %v1156_v22 = vor.u32 1.1754944e-38, %v1155_v16  ;;  %vm1154_vm1 = vcmp.eq.f32.partialorder %v1153_v31, 8.507059e+37  ;;  %v1261_v30 = vpop.f32.mrf.mxu1 }
 0x5ad   :  { %v1630_v48 = vpop.eup %1629 }
 0x5ae   :  { %v1163_v6 = vadd.f32 1.0, %v1630_v48 }
 0x5b0   :  { %v1632_v8 = vpop.eup %1631  ;;  %1633 = vrcp.f32 %v1163_v6  ;;  %v1175_v19 = vand.u32 2147483648, %v1163_v6  ;;  %v1173_v24 = vand.u32 2147483647, %v1163_v6  ;;  %vm1169_vm3 = vweird.f32 %v1163_v6 }
 0x5b1   :  { %v1145_v32 = vmul.f32 %v1632_v8, %v1143_v28  ;;  %vm1150_vm14 = vweird.f32 %v1632_v8 }
 0x5b2   :  { %vm1151_vm0 = vmor %vm1149_vm15, %vm1150_vm14  ;;  %v1176_v14 = vor.u32 1.1754944e-38, %v1175_v19  ;;  %vm1174_vm5 = vcmp.eq.f32.partialorder %v1173_v24, 8.507059e+37 }
 0x5b3   :  { %v1146_v51 = vsub.f32 1.0, %v1145_v32 }
 0x5b4   :  { %v1264_v33 = vpop.f32.mrf.mxu1 }
 0x5b5   :  { %v1147_v62 = vmul.f32 %v1632_v8, %v1146_v51 }
 0x5b6   :  { %v1634_v61 = vpop.eup %1633 }
 0x5b7   :  { %v1165_v11 = vmul.f32 %v1634_v61, %v1163_v6  ;;  %v1148_v29 = vadd.f32 %v1632_v8, %v1147_v62  ;;  %vm1170_vm2 = vweird.f32 %v1634_v61 }
 0x5b8   :  { %vm1171_vm4 = vmor %vm1169_vm3, %vm1170_vm2 }
 0x5b9   :  { %v1166_v46 = vsub.f32 1.0, %v1165_v11  ;;  %v1152_v5 = vsel %vm1151_vm0, %v1632_v8, %v1148_v29  ;;  %vm1454_vm0 = vcmask 15360  }
 0x5ba   :  { %v1157_v15 = vsel %vm1154_vm1, %v1156_v22, %v1152_v5 }
 0x5bb   :  { %v1167_v23 = vmul.f32 %v1634_v61, %v1166_v46  ;;  %v1199_v21 = vmul.f32 %v1197_v12, %v1157_v15 }
 0x5bc   :  { %v1267_v59 = vpop.f32.mrf.mxu1 }
 0x5bd   :  { %v1168_v7 = vadd.f32 %v1634_v61, %v1167_v23  ;;  %v1200_v25 = vadd.f32 %v1199_v21, %v307_v13 }
 0x5bf   :  { %v1172_v26 = vsel %vm1171_vm4, %v1634_v61, %v1168_v7  ;;  %1635 = vtanh.f32 %v1200_v25 }
 0x5c0   :  { %v1177_v27 = vsel %vm1174_vm5, %v1176_v14, %v1172_v26 }
 0x5c1   :  { %v1202_v9 = vsub.f32 1.0, %v1177_v27  ;;  %v1204_v10 = vmul.f32 %v1177_v27, %v2279_v43 }
 0x5c4   :  { %v1270_v35 = vpop.f32.mrf.mxu1 }
 0x5c5   :  { %v1636_v63 = vpop.eup %1635 }
 0x5c6   :  { %v1203_v17 = vmul.f32 %v1636_v63, %v1202_v9 }
 0x5c8   :  { %v2308_v3 = vadd.f32 %v1204_v10, %v1203_v17 }
 0x5ca   :  { %1527 = vmatmul.msk.f32.vlgmr.msra.gmra.mxu0 %vm322_vm10, %v2308_v3  ;;  %1535 = vmatmul.msk.f32.gmra.mxu1 %vm322_vm10, %v2308_v3 }
 0x5cc   :  { %v1273_v36 = vpop.f32.mrf.mxu1 }
 0x5d4   :  { %v1276_v1 = vpop.f32.mrf.mxu1 }
 0x647   :  { %v1234_v39 = vpop.f32.mrf.mxu0  ;;  %v1279_v57 = vpop.f32.mrf.mxu1 }
 0x648   :  { %v1235_v37 = vadd.f32 %v1554_v34, %v1234_v39 }
 0x64a   :  { %v1271_v38 = vadd.f32 %v1270_v35, %v1235_v37  ;;  %v1265_v40 = vadd.f32 %v1264_v33, %v1235_v37  ;;  %v1259_v41 = vadd.f32 %v1258_v42, %v1235_v37  ;;  %v1274_v44 = vadd.f32 %v1273_v36, %v1235_v37 }
 0x64b   :  { %v1268_v45 = vadd.f32 %v1267_v59, %v1235_v37  ;;  %v1262_v49 = vadd.f32 %v1261_v30, %v1235_v37  ;;  %v1280_v2 = vadd.f32 %v1279_v57, %v1235_v37  ;;  %v1277_v32 = vadd.f32 %v1276_v1, %v1235_v37  ;;  %v1397_v1 = vld [vmem:[%s2370_s15 + $0x10] sm:$0xff] }
 0x64c   :  { %1637 = vtanh.f32 %v1271_v38 }
 0x64d   :  { %1639 = vtanh.f32 %v1265_v40 }
 0x64e   :  { %1641 = vtanh.f32 %v1259_v41  ;;  %v1398_v41 = vld [vmem:[%s2370_s15 + $0x18] sm:$0xff] }
 0x64f   :  { %1643 = vtanh.f32 %v1274_v44  ;;  %1418 = vmatpush.msra.mxu2 %v1398_v41 }
 0x650   :  { %1645 = vtanh.f32 %v1268_v45 }
 0x651   :  { %1647 = vtanh.f32 %v1262_v49  ;;  %v1396_v49 = vld [vmem:[%s2370_s15 + $0x8] sm:$0xff]  ;;  %1419 = vmatpush.msra.mxu2 %v1397_v1 }
 0x652   :  { %v1638_v52 = vpop.eup %1637  ;;  %1649 = vtanh.f32 %v1280_v2 }
 0x653   :  { %v1640_v53 = vpop.eup %1639  ;;  %v1298_v0 = vmul.f32 %v1638_v52, %v1555_v50  ;;  %1651 = vtanh.f32 %v1277_v32  ;;  %1420 = vmatpush.msra.mxu2 %v1396_v49 }
 0x654   :  { %v1642_v56 = vpop.eup %1641  ;;  %v1296_v58 = vmul.f32 %v1640_v53, %v1555_v50  ;;  %v1395_v53 = vld [vmem:[%s2370_s15] sm:$0xff] }
 0x655   :  { %v1314_v28 = vsel %vm322_vm10, %v1298_v0, 0.0  ;;  %v1294_v48 = vmul.f32 %v1642_v56, %v1555_v50  ;;  %v1644_v6 = vpop.eup %1643  ;;  %1421 = vmatpush.msra.mxu2 %v1395_v53 }
 0x656   :  { %1315 = vadd.xlane.f32.xlu2 %v1314_v28  ;;  %v1308_v8 = vsel %vm322_vm10, %v1296_v58, 0.0  ;;  %v1646_v51 = vpop.eup %1645  ;;  %v1299_v31 = vmul.f32 %v1644_v6, %v1555_v50 }
 0x657   :  { %1309 = vadd.xlane.f32.xlu1 %v1308_v8  ;;  %v1302_v16 = vsel %vm322_vm10, %v1294_v48, 0.0  ;;  %v1648_v62 = vpop.eup %1647  ;;  %v1297_v61 = vmul.f32 %v1646_v51, %v1555_v50 }
 0x658   :  { %1303 = vadd.xlane.f32.xlu0 %v1302_v16  ;;  %v1295_v4 = vmul.f32 %v1648_v62, %v1555_v50  ;;  %v1317_v11 = vsel %vm322_vm10, %v1299_v31, 0.0  ;;  %v1650_v22 = vpop.eup %1649 }
 0x659   :  { %v1311_v29 = vsel %vm322_vm10, %v1297_v61, 0.0  ;;  %v1652_v5 = vpop.eup %1651  ;;  %v1301_v12 = vmul.f32 %v1650_v22, %v1555_v50 }
 0x65a   :  { %v1305_v46 = vsel %vm322_vm10, %v1295_v4, 0.0  ;;  %v1300_v13 = vmul.f32 %v1652_v5, %v1555_v50 }
 0x65b   :  { %v1323_v15 = vsel %vm322_vm10, %v1301_v12, 0.0 }
 0x65c   :  { %v1320_v23 = vsel %vm322_vm10, %v1300_v13, 0.0 }
 0x65e   :  { %1318 = vadd.xlane.f32.xlu2 %v1317_v11 }
 0x65f   :  { %1312 = vadd.xlane.f32.xlu1 %v1311_v29 }
 0x660   :  { %1306 = vadd.xlane.f32.xlu0 %v1305_v46 }
 0x667   :  { %1324 = vadd.xlane.f32.xlu1 %v1323_v15 }
 0x668   :  { %1321 = vadd.xlane.f32.xlu0 %v1320_v23 }
 0x6c9   :  { %v1316_v24 = vpop.xlane.xlu2 %1315 }
 0x6ca   :  { %v1310_v19 = vpop.xlane.xlu1 %1309 }
 0x6cb   :  { %v1304_v21 = vpop.xlane.xlu0 %1303 }
 0x6d1   :  { %v1319_v63 = vpop.xlane.xlu2 %1318 }
 0x6d2   :  { %v1313_v14 = vpop.xlane.xlu1 %1312 }
 0x6d3   :  { %v1307_v7 = vpop.xlane.xlu0 %1306 }
 0x6d4   :  { %v1326_v25 = vmax.f32 %v1304_v21, %v1307_v7 }
 0x6d6   :  { %v1327_v26 = vmax.f32 %v1326_v25, %v1310_v19 }
 0x6d8   :  { %v1328_v27 = vmax.f32 %v1327_v26, %v1313_v14 }
 0x6da   :  { %v1329_v9 = vmax.f32 %v1328_v27, %v1316_v24  ;;  %v1325_v30 = vpop.xlane.xlu1 %1324 }
 0x6db   :  { %v1322_v10 = vpop.xlane.xlu0 %1321 }
 0x6dc   :  { %v1330_v17 = vmax.f32 %v1329_v9, %v1319_v63 }
 0x6de   :  { %v1331_v42 = vmax.f32 %v1330_v17, %v1322_v10 }
 0x6e0   :  { %v1332_v33 = vmax.f32 %v1331_v42, %v1325_v30 }
 0x6e2   :  { %v1333_v59 = vsub.f32 %v1304_v21, %v1332_v33  ;;  %v1336_v35 = vsub.f32 %v1307_v7, %v1332_v33  ;;  %v1339_v36 = vsub.f32 %v1310_v19, %v1332_v33  ;;  %v1342_v34 = vsub.f32 %v1313_v14, %v1332_v33 }
 0x6e3   :  { %v1345_v40 = vsub.f32 %v1316_v24, %v1332_v33  ;;  %v1348_v45 = vsub.f32 %v1319_v63, %v1332_v33  ;;  %v1351_v52 = vsub.f32 %v1322_v10, %v1332_v33  ;;  %v1354_v56 = vsub.f32 %v1325_v30, %v1332_v33 }
 0x6e4   :  { %v1334_v39 = vmul.f32 1.442695, %v1333_v59  ;;  %v1337_v37 = vmul.f32 1.442695, %v1336_v35  ;;  %v1340_v38 = vmul.f32 1.442695, %v1339_v36 }
 0x6e5   :  { %v1343_v44 = vmul.f32 1.442695, %v1342_v34  ;;  %v1346_v50 = vmul.f32 1.442695, %v1345_v40  ;;  %v1349_v0 = vmul.f32 1.442695, %v1348_v45 }
 0x6e6   :  { %1653 = vpow2.f32 %v1334_v39  ;;  %v1352_v2 = vmul.f32 1.442695, %v1351_v52  ;;  %v1355_v6 = vmul.f32 1.442695, %v1354_v56 }
 0x6e7   :  { %1655 = vpow2.f32 %v1337_v37  ;;  %v1445_v37 = vlaneseq }
 0x6e8   :  { %1657 = vpow2.f32 %v1340_v38 }
 0x6e9   :  { %1659 = vpow2.f32 %v1343_v44  ;;  %v1446_v44 = vand.u32 127, %v1445_v37 }
 0x6ea   :  { %1661 = vpow2.f32 %v1346_v50 }
 0x6eb   :  { %1663 = vpow2.f32 %v1349_v0  ;;  %vm1450_vm14 = vcmp.lt.s32.totalorder %v1446_v44, 2  ;;  %vm1447_vm15 = vcmp.lt.s32.totalorder %v1446_v44, 1 }
 0x6ec   :  { %v1654_v57 = vpop.eup %1653  ;;  %1665 = vpow2.f32 %v1352_v2 }
 0x6ed   :  { %v1656_v58 = vpop.eup %1655  ;;  %v1364_v8 = vmul.f32 %v1654_v57, %v2135_v47  ;;  %1667 = vpow2.f32 %v1355_v6 }
 0x6ee   :  { %v1357_v28 = vadd.f32 %v1656_v58, %v1654_v57  ;;  %v1658_v48 = vpop.eup %1657  ;;  %v1365_v32 = vmul.f32 %v1656_v58, %v2160_v54 }
 0x6ef   :  { %v1660_v16 = vpop.eup %1659  ;;  %v1367_v29 = vmul.f32 %v1658_v48, %v2185_v60 }
 0x6f0   :  { %v1358_v51 = vadd.f32 %v1658_v48, %v1357_v28  ;;  %v1662_v31 = vpop.eup %1661  ;;  %v1366_v61 = vadd.f32 %v1365_v32, %v1364_v8  ;;  %v1369_v47 = vmul.f32 %v1660_v16, %v2218_v20 }
 0x6f1   :  { %v1664_v11 = vpop.eup %1663  ;;  %v1371_v23 = vmul.f32 %v1662_v31, %v2245_v18 }
 0x6f2   :  { %v1359_v62 = vadd.f32 %v1660_v16, %v1358_v51  ;;  %v1666_v46 = vpop.eup %1665  ;;  %v1368_v5 = vadd.f32 %v1367_v29, %v1366_v61  ;;  %v1373_v21 = vmul.f32 %v1664_v11, %v2264_v55 }
 0x6f3   :  { %v1668_v13 = vpop.eup %1667  ;;  %v1375_v60 = vmul.f32 %v1666_v46, %v2279_v43  ;;  %v1556_v43 = vld [vmem:[%s2371_s16] ss:$0 sm:$0xff] }
 0x6f4   :  { %v1360_v4 = vadd.f32 %v1662_v31, %v1359_v62  ;;  %v1370_v54 = vadd.f32 %v1369_v47, %v1368_v5  ;;  %v1377_v20 = vmul.f32 %v1668_v13, %v2308_v3 }
 0x6f6   :  { %v1361_v22 = vadd.f32 %v1664_v11, %v1360_v4  ;;  %v1372_v19 = vadd.f32 %v1371_v23, %v1370_v54 }
 0x6f8   :  { %v1362_v12 = vadd.f32 %v1666_v46, %v1361_v22  ;;  %v1374_v7 = vadd.f32 %v1373_v21, %v1372_v19 }
 0x6fa   :  { %v1363_v15 = vadd.f32 %v1668_v13, %v1362_v12  ;;  %v1376_v27 = vadd.f32 %v1375_v60, %v1374_v7 }
 0x6fc   :  { %1669 = vrcp.f32 %v1363_v15  ;;  %v1390_v26 = vand.u32 2147483648, %v1363_v15  ;;  %v1388_v63 = vand.u32 2147483647, %v1363_v15  ;;  %vm1384_vm7 = vweird.f32 %v1363_v15 }
 0x6fd   :  { %v1378_v10 = vadd.f32 %v1377_v20, %v1376_v27 }
 0x6fe   :  { %v1391_v18 = vor.u32 1.1754944e-38, %v1390_v26  ;;  %vm1389_vm9 = vcmp.eq.f32.partialorder %v1388_v63, 8.507059e+37 }
 0x702   :  { %v1670_v24 = vpop.eup %1669 }
 0x703   :  { %v1380_v25 = vmul.f32 %v1670_v24, %v1363_v15  ;;  %vm1385_vm6 = vweird.f32 %v1670_v24 }
 0x704   :  { %vm1386_vm8 = vmor %vm1384_vm7, %vm1385_vm6 }
 0x705   :  { %v1381_v14 = vsub.f32 1.0, %v1380_v25 }
 0x707   :  { %v1382_v9 = vmul.f32 %v1670_v24, %v1381_v14 }
 0x709   :  { %v1383_v17 = vadd.f32 %v1670_v24, %v1382_v9 }
 0x70b   :  { %v1387_v42 = vsel %vm1386_vm8, %v1670_v24, %v1383_v17 }
 0x70c   :  { %v1392_v55 = vsel %vm1389_vm9, %v1391_v18, %v1387_v42 }
 0x70d   :  { %v1394_v30 = vmul.f32 %v1392_v55, %v1378_v10 }
 0x70f   :  { %1536 = vmatmul.msk.f32.vlgmr.msra.gmra.mxu2 %vm322_vm10, %v1394_v30 }
 0x792   :  { %v1423_v33 = vpop.f32.mrf.mxu2 }
 0x793   :  { %v1424_v59 = vadd.f32 %v1556_v43, %v1423_v33 }
 0x795   :  { %v1537_v35 = vmul.f32 -1.442695, %v1424_v59 }
 0x797   :  { %1671 = vpow2.f32 %v1537_v35 }
 0x79d   :  { %v1672_v3 = vpop.eup %1671 }
 0x79e   :  { %v1429_v36 = vadd.f32 1.0, %v1672_v3 }
 0x7a0   :  { %1673 = vrcp.f32 %v1429_v36  ;;  %v1441_v40 = vand.u32 2147483648, %v1429_v36  ;;  %v1439_v1 = vand.u32 2147483647, %v1429_v36  ;;  %vm1435_vm10 = vweird.f32 %v1429_v36 }
 0x7a2   :  { %v1442_v49 = vor.u32 1.1754944e-38, %v1441_v40  ;;  %vm1440_vm13 = vcmp.eq.f32.partialorder %v1439_v1, 8.507059e+37 }
 0x7a6   :  { %v1674_v34 = vpop.eup %1673 }
 0x7a7   :  { %v1431_v39 = vmul.f32 %v1674_v34, %v1429_v36  ;;  %vm1436_vm11 = vweird.f32 %v1674_v34 }
 0x7a8   :  { %vm1437_vm12 = vmor %vm1435_vm10, %vm1436_vm11 }
 0x7a9   :  { %v1432_v38 = vsub.f32 1.0, %v1431_v39 }
 0x7ab   :  { %v1433_v41 = vmul.f32 %v1674_v34, %v1432_v38 }
 0x7ad   :  { %v1434_v45 = vadd.f32 %v1674_v34, %v1433_v41 }
 0x7af   :  { %v1438_v50 = vsel %vm1437_vm12, %v1674_v34, %v1434_v45 }
 0x7b0   :  { %v1443_v52 = vsel %vm1440_vm13, %v1442_v49, %v1438_v50 }
 0x7b1   :  { %v1448_v53 = vmul.f32 2.0, %v1443_v52  ;;  %v1451_v0 = vmul.f32 10.0, %v1443_v52 }
 0x7b3   :  { %v1538_v56 = vadd.f32 -1.0, %v1448_v53  ;;  %v1452_v57 = vsel %vm1450_vm14, %v1451_v0, %v1424_v59 }
 0x7b5   :  { %v1453_v58 = vsel %vm1447_vm15, %v1538_v56, %v1452_v57 }
 0x7b6   :  { %1455 = vst.msk [vmem:[%s2379_s28] sm:$0xff] %vm1454_vm0, %v1453_v58 }
 0x7b7   :  { %1460 = vsyncpa [#allocation3], 1 }
 0x7b8   :  { %1461 = vsyncpa [#allocation5], 1 }
 0x7b9   :  { %1462 = vsyncpa [#allocation8], 1 }

</bundles_post_ra>
